<compile_context>
chip_gen: v7x
topology: tpu7x:2x2x1
jax: 0.10.0
libtpu: 0.0.40
codegen_flags: <defaults>
</compile_context>

<pallas_src>
import math

import jax
import jax.numpy as jnp
from jax.experimental import pallas as pl
from jax.experimental.pallas import tpu as pltpu

POS_IN = 3     # xyz
POS_PAD = 8    # zero-padded pos-embed input width (cleaner contracting dim for the MXU)

_HI = jax.lax.Precision.HIGHEST   # full-f32 matmuls (match the f32 reference numerics)


# ----------------------------------------------------------------------------
# Fused kernel: one (batch element, layer) per grid step.
# Grid = (B, NUM_LAYERS); the output block for batch b is revisited across the
# layer axis and acts as the VMEM-resident activation carry.
# ----------------------------------------------------------------------------
def fused_encoder_kernel(src_ref, qp_ref,
                         wqkv_ref, bqkv_ref, wo_ref, bo_ref,
                         pe_w1_ref, pe_b1_ref, pe_w2_ref, pe_b2_ref,
                         out_ref):
    D = out_ref.shape[-1]

    # Layer 0: seed the resident activation block with the input.
    @pl.when(pl.program_id(1) == 0)
    def _():
        out_ref[...] = src_ref[...]

    x = out_ref[0].astype(jnp.float32)          # (L, D) current layer input
    qp = qp_ref[0].astype(jnp.float32)          # (L, POS_PAD)

    # ---- positional embedding MLP: 3(->8) -> D -> D, pointwise ----
    h1 = jnp.maximum(
        jnp.dot(qp, pe_w1_ref[0], preferred_element_type=jnp.float32, precision=_HI)
        + pe_b1_ref[0], 0.0)
    pos = (jnp.dot(h1, pe_w2_ref[0], preferred_element_type=jnp.float32, precision=_HI)
           + pe_b2_ref[0])                       # (L, D)

    h = x + pos                                  # query = key = value = src + pos

    # ---- fused QKV projection (scale already folded into the Q slice) ----
    qkv = (jnp.dot(h, wqkv_ref[0], preferred_element_type=jnp.float32, precision=_HI)
           + bqkv_ref[0])                        # (L, 3D)
    q = qkv[:, :D]
    k = qkv[:, D:2 * D]
    v = qkv[:, 2 * D:]

    # ---- scaled dot-product attention (single head) ----
    s = jax.lax.dot_general(q, k, (((1,), (1,)), ((), ())),
                            preferred_element_type=jnp.float32, precision=_HI)          # (L, L)
    s = s - jnp.max(s, axis=-1, keepdims=True)                                          # stable softmax
    p = jnp.exp(s)
    p = p / jnp.sum(p, axis=-1, keepdims=True)   # exact divide (approx recip hurt accuracy)

    attn = jnp.dot(p, v, preferred_element_type=jnp.float32, precision=_HI)             # (L, D)
    src2 = (jnp.dot(attn, wo_ref[0], preferred_element_type=jnp.float32, precision=_HI)
            + bo_ref[0])

    # ---- residual ----
    y = x + src2

    # ---- InstanceNorm1d over the sequence axis, per (batch, channel), no affine ----
    mean = jnp.mean(y, axis=0, keepdims=True)
    var = jnp.mean((y - mean) * (y - mean), axis=0, keepdims=True)                      # biased var
    y = (y - mean) * jax.lax.rsqrt(var + 1e-5)

    # ---- ReLU, write back into the resident activation block ----
    out_ref[0] = jnp.maximum(y, 0.0).astype(out_ref.dtype)


# ----------------------------------------------------------------------------
# Wrapper: whole TransformerEncoder forward in a single pallas_call.
# Public layout matches PyTorch: src is (num_imgs, batch, dim) = (L, B, D).
# ----------------------------------------------------------------------------
def transformer_encoder(src_lbd, query_pos_bl3, packed_params):
    (wqkv, bqkv, wo, bo, pe_w1, pe_b1, pe_w2, pe_b2) = packed_params
    L, B, D = src_lbd.shape
    num_layers = wqkv.shape[0]
    p_pad = pe_w1.shape[1]

    # Zero-pad xyz coords to POS_PAD on the lane axis (matching zero-padded pe_w1 rows).
    qp_pad = jnp.zeros((B, L, p_pad), src_lbd.dtype)
    qp_pad = qp_pad.at[:, :, :query_pos_bl3.shape[-1]].set(query_pos_bl3.astype(src_lbd.dtype))

    # Single tiny transpose per forward (not per layer); inverse applied on the output.
    x_bld = jnp.transpose(src_lbd, (1, 0, 2))                 # (B, L, D)

    # Advisory cost estimate so XLA schedules around the fused custom call sensibly.
    flops_step = (2 * L * p_pad * D + 2 * L * D * D           # pos MLP
                  + 2 * L * D * (3 * D)                       # fused QKV
                  + 2 * L * L * D + 2 * L * L * D             # scores + attn@V
                  + 2 * L * D * D)                            # output projection
    flops = B * num_layers * flops_step
    transcendentals = B * num_layers * (L * L + D)            # softmax exp + rsqrt
    param_bytes = 4 * num_layers * (D * 3 * D + 3 * D + D * D + D
                                    + p_pad * D + D + D * D + D)
    act_bytes = 4 * (2 * B * L * D + B * L * p_pad)
    cost = pl.CostEstimate(flops=int(flops),
                           transcendentals=int(transcendentals),
                           bytes_accessed=int(act_bytes + B * param_bytes))

    tok_spec = pl.BlockSpec((1, L, D), lambda b, l: (b, 0, 0))
    qp_spec = pl.BlockSpec((1, L, p_pad), lambda b, l: (b, 0, 0))
    per_layer = lambda shape: pl.BlockSpec((1,) + shape, lambda b, l: (l, 0, 0))

    out_bld = pl.pallas_call(
        fused_encoder_kernel,
        out_shape=jax.ShapeDtypeStruct((B, L, D), src_lbd.dtype),
        grid=(B, num_layers),
        in_specs=[
            tok_spec,                       # src (seed for layer 0)
            qp_spec,                        # padded query_pos
            per_layer((D, 3 * D)),          # Wqkv  (scale folded into the Q block)
            per_layer((1, 3 * D)),          # bqkv
            per_layer((D, D)),              # Wo
            per_layer((1, D)),              # bo
            per_layer((p_pad, D)),          # pos-embed W1 (zero-padded rows)
            per_layer((1, D)),              # pos-embed b1
            per_layer((D, D)),              # pos-embed W2
            per_layer((1, D)),              # pos-embed b2
        ],
        out_specs=tok_spec,                 # revisited across the layer axis -> VMEM-resident carry
        compiler_params=pltpu.CompilerParams(
            dimension_semantics=("parallel", "arbitrary")),
        cost_estimate=cost,
    )(x_bld, qp_pad, wqkv, bqkv, wo, bo, pe_w1, pe_b1, pe_w2, pe_b2)

    return jnp.transpose(out_bld, (1, 0, 2))                  # back to (L, B, D)


# ----------------------------------------------------------------------------
# Parameter init (per-layer tuples, mirroring the PyTorch module) and packing
# into stacked kernel inputs (QKV fusion, scale folding, pos-input padding).
# ----------------------------------------------------------------------------
def init_params(key, num_layers, d_model, pos_in=POS_IN):
    params = []
    for _ in range(num_layers):
        key, *ks = jax.random.split(key, 9)
        s = 1.0 / math.sqrt(d_model)
        layer_params = (
            jax.random.normal(ks[0], (d_model, d_model), jnp.float32) * s,   # Wq
            jax.random.normal(ks[1], (d_model, d_model), jnp.float32) * s,   # Wk
            jax.random.normal(ks[2], (d_model, d_model), jnp.float32) * s,   # Wv
            jax.random.normal(ks[3], (d_model, d_model), jnp.float32) * s,   # Wo
            jax.random.normal(ks[4], (1, d_model), jnp.float32) * 0.01,      # bq
            jax.random.normal(ks[5], (1, d_model), jnp.float32) * 0.01,      # bk
            jax.random.normal(ks[6], (1, d_model), jnp.float32) * 0.01,      # bv
            jax.random.normal(ks[7], (1, d_model), jnp.float32) * 0.01,      # bo
        )
        key, k1, k2, k3, k4 = jax.random.split(key, 5)
        pe_params = (
            jax.random.normal(k1, (pos_in, d_model), jnp.float32) * (1.0 / math.sqrt(pos_in)),
            jax.random.normal(k2, (1, d_model), jnp.float32) * 0.01,
            jax.random.normal(k3, (d_model, d_model), jnp.float32) * (1.0 / math.sqrt(d_model)),
            jax.random.normal(k4, (1, d_model), jnp.float32) * 0.01,
        )
        params.append((layer_params, pe_params))
    return params


def pack_params(params, d_model, pos_pad=POS_PAD):
    scale = 1.0 / math.sqrt(d_model)
    wqkv, bqkv, wo, bo, w1, b1, w2, b2 = ([] for _ in range(8))
    for (wq, wk, wv, wo_l, bq, bk, bv, bo_l), (pw1, pb1, pw2, pb2) in params:
        wqkv.append(jnp.concatenate([wq * scale, wk, wv], axis=1))          # fold 1/sqrt(D) into Wq
        bqkv.append(jnp.concatenate([bq * scale, bk, bv], axis=1))
        wo.append(wo_l)
        bo.append(bo_l)
        w1.append(jnp.zeros((pos_pad, d_model), pw1.dtype).at[:pw1.shape[0]].set(pw1))
        b1.append(pb1)
        w2.append(pw2)
        b2.append(pb2)
    stack = lambda xs: jnp.stack(xs, axis=0)
    return (stack(wqkv), stack(bqkv), stack(wo), stack(bo),
            stack(w1), stack(b1), stack(w2), stack(b2))


# ----------------------------------------------------------------------------
# Pure-JAX reference (unfused, unpacked params, explicit scale) for validation.
# ----------------------------------------------------------------------------
def reference_forward(src_lbd, query_pos_bl3, params, d_model):
    x = jnp.transpose(src_lbd, (1, 0, 2))                     # (B, L, D)
    scale = 1.0 / math.sqrt(d_model)
    for (wq, wk, wv, wo, bq, bk, bv, bo), (pw1, pb1, pw2, pb2) in params:
        h1 = jnp.maximum(query_pos_bl3 @ pw1 + pb1, 0.0)
        pos = h1 @ pw2 + pb2                                  # (B, L, D)
        h = x + pos
        q = h @ wq + bq
        k = h @ wk + bk
        v = h @ wv + bv
        s = jnp.einsum('bid,bjd->bij', q, k) * scale
        s = s - s.max(-1, keepdims=True)
        p = jnp.exp(s)
        p = p / p.sum(-1, keepdims=True)
        attn = jnp.einsum('bij,bjd->bid', p, v)
        src2 = attn @ wo + bo
        y = x + src2
        mean = y.mean(axis=1, keepdims=True)
        var = ((y - mean) ** 2).mean(axis=1, keepdims=True)
        y = (y - mean) * jax.lax.rsqrt(var + 1e-5)
        x = jnp.maximum(y, 0.0)
    return jnp.transpose(x, (1, 0, 2))                        # (L, B, D)


if __name__ == "__main__":
    L, B, D = 16, 2, 32          # num_imgs (seq), batch, d_model
    NUM_LAYERS = 2

    key = jax.random.PRNGKey(0)
    k_src, k_pos, k_par = jax.random.split(key, 3)
    src = jax.random.normal(k_src, (L, B, D), jnp.float32)             # (num_imgs, batch, dim)
    query_pos = jax.random.normal(k_pos, (B, L, POS_IN), jnp.float32)  # xyz coords per point

    params = init_params(k_par, NUM_LAYERS, D)
    packed = pack_params(params, D)

    fwd = jax.jit(transformer_encoder)
    out = fwd(src, query_pos, packed)
    jax.block_until_ready(out)
    assert out.shape == (L, B, D)

    # Correctness check vs unfused float32 reference.
    with jax.default_matmul_precision("float32"):
        ref = reference_forward(src, query_pos, params, D)
    max_err = float(jnp.max(jnp.abs(out - ref)))
    assert max_err < 2e-3, f"max abs error vs reference too large: {max_err}"

    print("KERNEL_OK")
</pallas_src>

<mosaic_0001>
module attributes {stable_mosaic.version = 11 : i64} {
  func.func @fused_encoder_kernel(%arg0: i32, %arg1: i32, %arg2: memref<1x16x32xf32, #tpu.memory_space<vmem>>, %arg3: memref<1x16x8xf32, #tpu.memory_space<vmem>>, %arg4: memref<1x32x96xf32, #tpu.memory_space<vmem>>, %arg5: memref<1x1x96xf32, #tpu.memory_space<vmem>>, %arg6: memref<1x32x32xf32, #tpu.memory_space<vmem>>, %arg7: memref<1x1x32xf32, #tpu.memory_space<vmem>>, %arg8: memref<1x8x32xf32, #tpu.memory_space<vmem>>, %arg9: memref<1x1x32xf32, #tpu.memory_space<vmem>>, %arg10: memref<1x32x32xf32, #tpu.memory_space<vmem>>, %arg11: memref<1x1x32xf32, #tpu.memory_space<vmem>>, %arg12: memref<1x16x32xf32, #tpu.memory_space<vmem>>) attributes {dimension_semantics = [#tpu.dimension_semantics<parallel>, #tpu.dimension_semantics<arbitrary>], iteration_bounds = array<i64: 2, 2>, scalar_prefetch = 0 : i64, scratch_operands = 0 : i64, tpu.core_type = #tpu.core_type<tc>, window_params = [{transform_indices = @transform_0, window_bounds = array<i64: 1, 16, 32>}, {transform_indices = @transform_1, window_bounds = array<i64: 1, 16, 8>}, {transform_indices = @transform_2, window_bounds = array<i64: 1, 32, 96>}, {transform_indices = @transform_3, window_bounds = array<i64: 1, 1, 96>}, {transform_indices = @transform_4, window_bounds = array<i64: 1, 32, 32>}, {transform_indices = @transform_5, window_bounds = array<i64: 1, 1, 32>}, {transform_indices = @transform_6, window_bounds = array<i64: 1, 8, 32>}, {transform_indices = @transform_7, window_bounds = array<i64: 1, 1, 32>}, {transform_indices = @transform_8, window_bounds = array<i64: 1, 32, 32>}, {transform_indices = @transform_9, window_bounds = array<i64: 1, 1, 32>}, {transform_indices = @transform_10, window_bounds = array<i64: 1, 16, 32>}]} {
    %c0_i32 = arith.constant 0 : i32
    %0 = arith.cmpi eq, %arg1, %c0_i32 : i32
    %1 = arith.extui %0 : i1 to i32
    %c0_i32_0 = arith.constant 0 : i32
    %2 = arith.cmpi ne, %1, %c0_i32_0 : i32
    scf.if %2 {
      %c0_47 = arith.constant 0 : index
      %c0_48 = arith.constant 0 : index
      %c0_49 = arith.constant 0 : index
      %78 = vector.load %arg2[%c0_47, %c0_48, %c0_49] : memref<1x16x32xf32, #tpu.memory_space<vmem>>, vector<1x16x32xf32>
      %c0_50 = arith.constant 0 : index
      %c0_51 = arith.constant 0 : index
      %c0_52 = arith.constant 0 : index
      %79 = vector.load %arg12[%c0_50, %c0_51, %c0_52] : memref<1x16x32xf32, #tpu.memory_space<vmem>>, vector<1x16x32xf32>
      tpu.vector_store %arg12[%c0_50, %c0_51, %c0_52], %78 {strides = array<i32>} : memref<1x16x32xf32, #tpu.memory_space<vmem>>, vector<1x16x32xf32>,
    } else {
    }
    %c0 = arith.constant 0 : index
    %c0_1 = arith.constant 0 : index
    %c0_2 = arith.constant 0 : index
    %3 = vector.load %arg12[%c0, %c0_1, %c0_2] : memref<1x16x32xf32, #tpu.memory_space<vmem>>, vector<1x16x32xf32>
    %4 = vector.shape_cast %3 : vector<1x16x32xf32> to vector<16x32xf32>
    %c0_3 = arith.constant 0 : index
    %c0_4 = arith.constant 0 : index
    %c0_5 = arith.constant 0 : index
    %5 = vector.load %arg3[%c0_3, %c0_4, %c0_5] : memref<1x16x8xf32, #tpu.memory_space<vmem>>, vector<1x16x8xf32>
    %6 = vector.shape_cast %5 : vector<1x16x8xf32> to vector<16x8xf32>
    %c0_6 = arith.constant 0 : index
    %c0_7 = arith.constant 0 : index
    %c0_8 = arith.constant 0 : index
    %7 = vector.load %arg8[%c0_6, %c0_7, %c0_8] : memref<1x8x32xf32, #tpu.memory_space<vmem>>, vector<1x8x32xf32>
    %8 = vector.shape_cast %7 : vector<1x8x32xf32> to vector<8x32xf32>
    %cst = arith.constant dense<0.000000e+00> : vector<16x32xf32>
    %9 = tpu.matmul %6, %8, %cst {dimension_numbers = #tpu.dot_dimension_numbers<[1], [0], [0], [1], [0, 0, 1, 1], [], []>, precision = #tpu.contract_precision<fp32>} : vector<16x8xf32>, vector<8x32xf32>, vector<16x32xf32> -> vector<16x32xf32>
    %c0_9 = arith.constant 0 : index
    %c0_10 = arith.constant 0 : index
    %c0_11 = arith.constant 0 : index
    %10 = vector.load %arg9[%c0_9, %c0_10, %c0_11] : memref<1x1x32xf32, #tpu.memory_space<vmem>>, vector<1x1x32xf32>
    %11 = vector.shape_cast %10 : vector<1x1x32xf32> to vector<1x32xf32>
    %12 = vector.broadcast %11 : vector<1x32xf32> to vector<16x32xf32>
    %13 = arith.addf %9, %12 : vector<16x32xf32>
    %cst_12 = arith.constant 0.000000e+00 : f32
    %14 = vector.broadcast %cst_12 : f32 to vector<16x32xf32>
    %15 = arith.maximumf %13, %14 : vector<16x32xf32>
    %c0_13 = arith.constant 0 : index
    %c0_14 = arith.constant 0 : index
    %c0_15 = arith.constant 0 : index
    %16 = vector.load %arg10[%c0_13, %c0_14, %c0_15] : memref<1x32x32xf32, #tpu.memory_space<vmem>>, vector<1x32x32xf32>
    %17 = vector.shape_cast %16 : vector<1x32x32xf32> to vector<32x32xf32>
    %cst_16 = arith.constant dense<0.000000e+00> : vector<16x32xf32>
    %18 = tpu.matmul %15, %17, %cst_16 {dimension_numbers = #tpu.dot_dimension_numbers<[1], [0], [0], [1], [0, 0, 1, 1], [], []>, precision = #tpu.contract_precision<fp32>} : vector<16x32xf32>, vector<32x32xf32>, vector<16x32xf32> -> vector<16x32xf32>
    %c0_17 = arith.constant 0 : index
    %c0_18 = arith.constant 0 : index
    %c0_19 = arith.constant 0 : index
    %19 = vector.load %arg11[%c0_17, %c0_18, %c0_19] : memref<1x1x32xf32, #tpu.memory_space<vmem>>, vector<1x1x32xf32>
    %20 = vector.shape_cast %19 : vector<1x1x32xf32> to vector<1x32xf32>
    %21 = vector.broadcast %20 : vector<1x32xf32> to vector<16x32xf32>
    %22 = arith.addf %18, %21 : vector<16x32xf32>
    %23 = arith.addf %4, %22 : vector<16x32xf32>
    %c0_20 = arith.constant 0 : index
    %c0_21 = arith.constant 0 : index
    %c0_22 = arith.constant 0 : index
    %24 = vector.load %arg4[%c0_20, %c0_21, %c0_22] : memref<1x32x96xf32, #tpu.memory_space<vmem>>, vector<1x32x96xf32>
    %25 = vector.shape_cast %24 : vector<1x32x96xf32> to vector<32x96xf32>
    %cst_23 = arith.constant dense<0.000000e+00> : vector<16x96xf32>
    %26 = tpu.matmul %23, %25, %cst_23 {dimension_numbers = #tpu.dot_dimension_numbers<[1], [0], [0], [1], [0, 0, 1, 1], [], []>, precision = #tpu.contract_precision<fp32>} : vector<16x32xf32>, vector<32x96xf32>, vector<16x96xf32> -> vector<16x96xf32>
    %c0_24 = arith.constant 0 : index
    %c0_25 = arith.constant 0 : index
    %c0_26 = arith.constant 0 : index
    %27 = vector.load %arg5[%c0_24, %c0_25, %c0_26] : memref<1x1x96xf32, #tpu.memory_space<vmem>>, vector<1x1x96xf32>
    %28 = vector.shape_cast %27 : vector<1x1x96xf32> to vector<1x96xf32>
    %29 = vector.broadcast %28 : vector<1x96xf32> to vector<16x96xf32>
    %30 = arith.addf %26, %29 : vector<16x96xf32>
    %31 = vector.extract_strided_slice %30 {offsets = [0, 0], sizes = [16, 32], strides = [1, 1]} : vector<16x96xf32> to vector<16x32xf32>
    %32 = vector.extract_strided_slice %30 {offsets = [0, 32], sizes = [16, 32], strides = [1, 1]} : vector<16x96xf32> to vector<16x32xf32>
    %33 = vector.extract_strided_slice %30 {offsets = [0, 64], sizes = [16, 32], strides = [1, 1]} : vector<16x96xf32> to vector<16x32xf32>
    %cst_27 = arith.constant dense<0.000000e+00> : vector<16x16xf32>
    %34 = tpu.matmul %31, %32, %cst_27 {dimension_numbers = #tpu.dot_dimension_numbers<[1], [1], [0], [0], [0, 0, 1, 0], [], []>, precision = #tpu.contract_precision<fp32>} : vector<16x32xf32>, vector<16x32xf32>, vector<16x16xf32> -> vector<16x16xf32>
    %cst_28 = arith.constant dense<0xFF800000> : vector<16xf32>
    %35 = vector.multi_reduction <maximumf>, %34, %cst_28 [1] : vector<16x16xf32> to vector<16xf32>
    %36 = vector.shape_cast %35 : vector<16xf32> to vector<16x1xf32>
    %37 = vector.broadcast %36 : vector<16x1xf32> to vector<16x16xf32>
    %38 = arith.subf %34, %37 : vector<16x16xf32>
    %39 = math.exp %38 : vector<16x16xf32>
    %cst_29 = arith.constant dense<0.000000e+00> : vector<16xf32>
    %40 = vector.multi_reduction <add>, %39, %cst_29 [1] : vector<16x16xf32> to vector<16xf32>
    %41 = vector.shape_cast %40 : vector<16xf32> to vector<16x1xf32>
    %42 = vector.broadcast %41 : vector<16x1xf32> to vector<16x16xf32>
    %43 = arith.divf %39, %42 : vector<16x16xf32>
    %cst_30 = arith.constant dense<0.000000e+00> : vector<16x32xf32>
    %44 = tpu.matmul %43, %33, %cst_30 {dimension_numbers = #tpu.dot_dimension_numbers<[1], [0], [0], [1], [0, 0, 1, 1], [], []>, precision = #tpu.contract_precision<fp32>} : vector<16x16xf32>, vector<16x32xf32>, vector<16x32xf32> -> vector<16x32xf32>
    %c0_31 = arith.constant 0 : index
    %c0_32 = arith.constant 0 : index
    %c0_33 = arith.constant 0 : index
    %45 = vector.load %arg6[%c0_31, %c0_32, %c0_33] : memref<1x32x32xf32, #tpu.memory_space<vmem>>, vector<1x32x32xf32>
    %46 = vector.shape_cast %45 : vector<1x32x32xf32> to vector<32x32xf32>
    %cst_34 = arith.constant dense<0.000000e+00> : vector<16x32xf32>
    %47 = tpu.matmul %44, %46, %cst_34 {dimension_numbers = #tpu.dot_dimension_numbers<[1], [0], [0], [1], [0, 0, 1, 1], [], []>, precision = #tpu.contract_precision<fp32>} : vector<16x32xf32>, vector<32x32xf32>, vector<16x32xf32> -> vector<16x32xf32>
    %c0_35 = arith.constant 0 : index
    %c0_36 = arith.constant 0 : index
    %c0_37 = arith.constant 0 : index
    %48 = vector.load %arg7[%c0_35, %c0_36, %c0_37] : memref<1x1x32xf32, #tpu.memory_space<vmem>>, vector<1x1x32xf32>
    %49 = vector.shape_cast %48 : vector<1x1x32xf32> to vector<1x32xf32>
    %50 = vector.broadcast %49 : vector<1x32xf32> to vector<16x32xf32>
    %51 = arith.addf %47, %50 : vector<16x32xf32>
    %52 = arith.addf %4, %51 : vector<16x32xf32>
    %cst_38 = arith.constant dense<0.000000e+00> : vector<32xf32>
    %53 = vector.multi_reduction <add>, %52, %cst_38 [0] : vector<16x32xf32> to vector<32xf32>
    %54 = vector.shape_cast %53 : vector<32xf32> to vector<1x32xf32>
    %cst_39 = arith.constant 1.600000e+01 : f32
    %55 = vector.broadcast %cst_39 : f32 to vector<1x32xf32>
    %56 = arith.divf %54, %55 : vector<1x32xf32>
    %57 = vector.broadcast %56 : vector<1x32xf32> to vector<16x32xf32>
    %58 = arith.subf %52, %57 : vector<16x32xf32>
    %59 = vector.broadcast %56 : vector<1x32xf32> to vector<16x32xf32>
    %60 = arith.subf %52, %59 : vector<16x32xf32>
    %61 = arith.mulf %58, %60 : vector<16x32xf32>
    %cst_40 = arith.constant dense<0.000000e+00> : vector<32xf32>
    %62 = vector.multi_reduction <add>, %61, %cst_40 [0] : vector<16x32xf32> to vector<32xf32>
    %63 = vector.shape_cast %62 : vector<32xf32> to vector<1x32xf32>
    %cst_41 = arith.constant 1.600000e+01 : f32
    %64 = vector.broadcast %cst_41 : f32 to vector<1x32xf32>
    %65 = arith.divf %63, %64 : vector<1x32xf32>
    %66 = vector.broadcast %56 : vector<1x32xf32> to vector<16x32xf32>
    %67 = arith.subf %52, %66 : vector<16x32xf32>
    %cst_42 = arith.constant 9.99999974E-6 : f32
    %68 = vector.broadcast %cst_42 : f32 to vector<1x32xf32>
    %69 = arith.addf %65, %68 : vector<1x32xf32>
    %70 = math.rsqrt %69 : vector<1x32xf32>
    %71 = vector.broadcast %70 : vector<1x32xf32> to vector<16x32xf32>
    %72 = arith.mulf %67, %71 : vector<16x32xf32>
    %cst_43 = arith.constant 0.000000e+00 : f32
    %73 = vector.broadcast %cst_43 : f32 to vector<16x32xf32>
    %74 = arith.maximumf %72, %73 : vector<16x32xf32>
    %c0_44 = arith.constant 0 : index
    %c0_45 = arith.constant 0 : index
    %c0_46 = arith.constant 0 : index
    %75 = vector.load %arg12[%c0_44, %c0_45, %c0_46] : memref<1x16x32xf32, #tpu.memory_space<vmem>>, vector<1x16x32xf32>
    %76 = vector.shape_cast %75 : vector<1x16x32xf32> to vector<16x32xf32>
    %77 = vector.shape_cast %74 : vector<16x32xf32> to vector<1x16x32xf32>
    tpu.vector_store %arg12[%c0_44, %c0_45, %c0_46], %77 {strides = array<i32>} : memref<1x16x32xf32, #tpu.memory_space<vmem>>, vector<1x16x32xf32>,
    return
  }
  func.func @transform_0(%arg0: i32, %arg1: i32) -> (i32, i32, i32) {
    %c0_i32 = arith.constant 0 : i32
    %c0_i32_0 = arith.constant 0 : i32
    %c0_i32_1 = arith.constant 0 : i32
    return %arg0, %c0_i32, %c0_i32_0 : i32, i32, i32
  }
  func.func @transform_1(%arg0: i32, %arg1: i32) -> (i32, i32, i32) {
    %c0_i32 = arith.constant 0 : i32
    %c0_i32_0 = arith.constant 0 : i32
    %c0_i32_1 = arith.constant 0 : i32
    return %arg0, %c0_i32, %c0_i32_0 : i32, i32, i32
  }
  func.func @transform_2(%arg0: i32, %arg1: i32) -> (i32, i32, i32) {
    %c0_i32 = arith.constant 0 : i32
    %c0_i32_0 = arith.constant 0 : i32
    %c0_i32_1 = arith.constant 0 : i32
    return %arg1, %c0_i32, %c0_i32_0 : i32, i32, i32
  }
  func.func @transform_3(%arg0: i32, %arg1: i32) -> (i32, i32, i32) {
    %c0_i32 = arith.constant 0 : i32
    %c0_i32_0 = arith.constant 0 : i32
    %c0_i32_1 = arith.constant 0 : i32
    return %arg1, %c0_i32, %c0_i32_0 : i32, i32, i32
  }
  func.func @transform_4(%arg0: i32, %arg1: i32) -> (i32, i32, i32) {
    %c0_i32 = arith.constant 0 : i32
    %c0_i32_0 = arith.constant 0 : i32
    %c0_i32_1 = arith.constant 0 : i32
    return %arg1, %c0_i32, %c0_i32_0 : i32, i32, i32
  }
  func.func @transform_5(%arg0: i32, %arg1: i32) -> (i32, i32, i32) {
    %c0_i32 = arith.constant 0 : i32
    %c0_i32_0 = arith.constant 0 : i32
    %c0_i32_1 = arith.constant 0 : i32
    return %arg1, %c0_i32, %c0_i32_0 : i32, i32, i32
  }
  func.func @transform_6(%arg0: i32, %arg1: i32) -> (i32, i32, i32) {
    %c0_i32 = arith.constant 0 : i32
    %c0_i32_0 = arith.constant 0 : i32
    %c0_i32_1 = arith.constant 0 : i32
    return %arg1, %c0_i32, %c0_i32_0 : i32, i32, i32
  }
  func.func @transform_7(%arg0: i32, %arg1: i32) -> (i32, i32, i32) {
    %c0_i32 = arith.constant 0 : i32
    %c0_i32_0 = arith.constant 0 : i32
    %c0_i32_1 = arith.constant 0 : i32
    return %arg1, %c0_i32, %c0_i32_0 : i32, i32, i32
  }
  func.func @transform_8(%arg0: i32, %arg1: i32) -> (i32, i32, i32) {
    %c0_i32 = arith.constant 0 : i32
    %c0_i32_0 = arith.constant 0 : i32
    %c0_i32_1 = arith.constant 0 : i32
    return %arg1, %c0_i32, %c0_i32_0 : i32, i32, i32
  }
  func.func @transform_9(%arg0: i32, %arg1: i32) -> (i32, i32, i32) {
    %c0_i32 = arith.constant 0 : i32
    %c0_i32_0 = arith.constant 0 : i32
    %c0_i32_1 = arith.constant 0 : i32
    return %arg1, %c0_i32, %c0_i32_0 : i32, i32, i32
  }
  func.func @transform_10(%arg0: i32, %arg1: i32) -> (i32, i32, i32) {
    %c0_i32 = arith.constant 0 : i32
    %c0_i32_0 = arith.constant 0 : i32
    %c0_i32_1 = arith.constant 0 : i32
    return %arg0, %c0_i32, %c0_i32_0 : i32, i32, i32
  }
}

</mosaic_0001>

<bundles_post_ra>
// kernel: transformer_encoder.1
= control target key start
LH: loop header
LB: loop body
LE: loop exit
PB: predicated region body
PF: predicated region fallthrough
CT: control target
= control target key end

     0   :  { %s5585_s0 = inlined_call_operand.vmem [shape: f32[2,16,32], index: 0, kind: input, shape index: {}]   ;;  %s5586_s1 = inlined_call_operand.vmem [shape: f32[2,16,8], index: 1, kind: input, shape index: {}]   ;;  %s5587_s2 = inlined_call_operand.vmem [shape: f32[2,32,96], index: 2, kind: input, shape index: {}]   ;;  %s5588_s3 = inlined_call_operand.hbm [shape: f32[2,1,96], index: 3, kind: input, shape index: {}]   ;;  %s5589_s4 = inlined_call_operand.vmem [shape: f32[2,32,32], index: 4, kind: input, shape index: {}]   ;;  %s5590_s5 = inlined_call_operand.hbm [shape: f32[2,1,32], index: 5, kind: input, shape index: {}]   ;;  %s5591_s6 = inlined_call_operand.hbm [shape: f32[2,8,32], index: 6, kind: input, shape index: {}]   ;;  %s5592_s7 = inlined_call_operand.hbm [shape: f32[2,1,32], index: 7, kind: input, shape index: {}]   ;;  %s5593_s8 = inlined_call_operand.vmem [shape: f32[2,32,32], index: 8, kind: input, shape index: {}]   ;;  %s5594_s9 = inlined_call_operand.vmem [shape: f32[2,1,32], index: 9, kind: input, shape index: {}]   ;;  %s5595_s10 = inlined_call_operand.vmem [shape: f32[2,16,32], index: 10, kind: output, shape index: {}]  }
   0x1   :  { %5603 = sst [smem:[#allocation17_spill]] %s5585_s0 }
   0x2   :  { %5604 = sst [smem:[#allocation18_spill]] %s5586_s1 }
   0x3   :  { %5605 = sst [smem:[#allocation19_spill]] %s5587_s2 }
   0x4   :  { %5606 = sst [smem:[#allocation20_spill]] %s5588_s3 }
   0x5   :  { %5607 = sst [smem:[#allocation21_spill]] %s5589_s4 }
   0x6   :  { %5608 = sst [smem:[#allocation22_spill]] %s5590_s5 }
   0x7   :  { %5609 = sst [smem:[#allocation23_spill]] %s5591_s6 }
   0x8   :  { %5610 = sst [smem:[#allocation24_spill]] %s5593_s8 }
   0x9   :  { %5611 = sst [smem:[#allocation25_spill]] %s5594_s9 }
   0xa   :  { %5612 = sst [smem:[#allocation26_spill]] %s5595_s10 }
   0xb   :  { %15 = vsyncpa [#allocation3], 0 }
   0xc   :  { %17 = vsyncpa [#allocation3 + $0x1], 0 }
   0xd   :  { %18 = vsyncpa [#allocation5], 0 }
   0xe   :  { %20 = vsyncpa [#allocation5 + $0x1], 0 }
   0xf   :  { %21 = vsyncpa [#allocation8], 0 }
  0x10   :  { %23 = vsyncpa [#allocation8 + $0x1], 0  ;;  %s5188_s13 = smov 0   ;;  %s5190_s14 = smov 0  }
  0x11   :  { %s5192_s15 = smov 0   ;;  %s5194_s16 = smov 0  }
  0x12   :  { %s5196_s17 = smov 0   ;;  %s5198_s18 = smov 0  }
  0x13   :  { %s5200_s19 = smov 0   ;;  %s5202_s20 = smov 0  }
  0x14 LB: > { %5613 = sst [smem:[#allocation12_spill]] %s5105_s15  ;;  %s5596_s21 = sadd.s32 4294967295, %s5125_s20   ;;  %s5125_s20 = sphi %s5202_s20, %s29_s20   ;;  %s5121_s19 = sphi %s5200_s19, %s5654_s19   ;;  %s5117_s18 = sphi %s5198_s18, %s5653_s18   ;;  %s5113_s17 = sphi %s5196_s17, %s5647_s17   ;;  %s5109_s16 = sphi %s5194_s16, %s5652_s16   ;;  %s5105_s15 = sphi %s5192_s15, %s5646_s15   ;;  %s5101_s14 = sphi %s5190_s14, %s5651_s14   ;;  %s5097_s13 = sphi %s5188_s13, %s5650_s13  }
  0x15   : > { %5614 = sst [smem:[#allocation13_spill]] %s5121_s19  ;;  %s38_s22 = sadd.s32 1, %s5117_s18 }
  0x16   : > { %p39_p0 = scmp.ge.s32.totalorder %s38_s22, 2  ;;  %s41_s23 = sadd.s32 1, %s5121_s19 }
  0x17   : > { %s126_s24 = sadd.s32 1, %s5105_s15  ;;  %p133_p1 = scmp.ne.s32.totalorder %s5105_s15, %s5101_s14 }
  0x18   : > { %s5656_s22 = smov (%p39_p0, %s38_s22), 0  ;;  %s5658_s23 = smov (!%p39_p0, %s41_s23), %s5121_s19 }
  0x19   : > { %5615 = sst [smem:[#allocation14_spill]] %s5656_s22  ;;  %s123_s25 = ssub.s32 %s5117_s18, %s5656_s22 }
  0x1a   : > { %p134_p2 = scmp.eq.s32.totalorder %s5125_s20, 0  ;;  %p43_p3 = scmp.ge.s32.totalorder %s5658_s23, 2 }
  0x1b   : > { %p124_p4 = scmp.eq.s32.totalorder %s123_s25, 0  ;;  %p139_p6 = scmp.ne.s32.totalorder %s5101_s14, %s5097_s13 }
  0x1c   : > { %p135_p5 = por %p134_p2, %p133_p1  ;;  %s5660_s23 = smov (%p43_p3, %s5658_s23), 0 }
  0x1d   : > { %5616 = sst [smem:[#allocation15_spill]] %s5660_s23  ;;  %p140_p7 = scmp.eq.s32.totalorder %s5596_s21, 0 }
  0x1e   : > { %s5242_s26 = scalar_select %p124_p4, %s5105_s15, %s126_s24  }
  0x1f   : > { %p4854_p8 = scmp.lt.s32.totalorder %s5125_s20, 4  ;;  %s5248_s27 = sand.u32 1, %s5105_s15  }
  0x20   : > { %5617 = sst [smem:[#allocation16_spill]] %s5242_s26  ;;  %p5250_p9 = por %p140_p7, %p139_p6 }
  0x21   : > { %s5255_s29 = sshll.u32 %s5117_s18, 4  ;;  %p5257_p10 = pnand %p4854_p8, %p135_p5 }
  0x22   : > { %s5618_s28 = scalar_select %p5250_p9, 1, 0 }
  0x23   : > { %s5619_s30 = scalar_select %p5257_p10, 1, 0 }
  0x24   : > { %s394_s11 = sand.u32 1, %s5125_s20   ;;  %s5620_s5 = sld [smem:[#allocation22_spill]] }
  0x25   : > { %s397_s25 = scalar_lea.vmem [#allocation4], %s5248_s27  ;;  %s5273_s23 = scalar_lea.sflag [#allocation5], %s394_s11 }
  0x26   : > { %s404_s21 = sshll.u32 %s397_s25, 4  ;;  %p5279_p0 = pneg %p5257_p10  ;;  %s5270_s21 = int_to_ptr.vmem [resolvable:$true] %s404_s21 }
  0x2a   : > { %s5266_s24 = scalar_lea.hbm %s5620_s5, %s5255_s29  ;;  %s4936_s25 = scalar_lea.hbm %s5620_s5, 32 }
  0x2b   : > { %s4931_s22 = scalar_lea.hbm %s5266_s24, 16  ;;  %p4937_p3 = scmp.lt.u32.totalorder %s5266_s24, %s5620_s5 }
  0x2c   : > { %p4932_p13 = scmp.ne.s32.totalorder %s5266_s24, %s4931_s22  ;;  %p4938_p4 = scmp.lt.u32.totalorder %s4936_s25, %s4931_s22 }
  0x2d   : > { %p4940_p6 = scmp.lt.u32.totalorder %s4931_s22, %s5266_s24 }
  0x2e   : > { %p4934_p1 = pnand %p5279_p0, %p4932_p13  ;;  %p4939_p5 = por %p4938_p4, %p4937_p3 }
  0x30   : > { %p4935_p2 = pneg %p4934_p1  ;;  %p4941_p7 = por %p4940_p6, %p4939_p5 }
  0x32   : > { %p4942_p8 = pnand %p4941_p7, %p4935_p2 }
  0x34   : > { %4945 = shalt.err (!%p4942_p8)
}
  0x35   : > { %s4946_s11 = scalar_lea.vmem %s5270_s21, 16  ;;  %s5127_s12 = smov [#allocation4]  }
  0x36   : > { %p4947_p13 = scmp.ne.s32.totalorder %s5270_s21, %s4946_s11  ;;  %s4951_s13 = sshll.u32 %s5127_s12, 4  ;;  %s4952_s13 = int_to_ptr.vmem [resolvable:$false] %s4951_s13 }
  0x37   : > { %s4953_s15 = scalar_lea.vmem %s4952_s13, 32  ;;  %p4954_p12 = scmp.lt.s32.totalorder %s5270_s21, %s4952_s13 }
  0x38   : > { %p4949_p1 = pnand %p4947_p13, %p5279_p0  ;;  %p4955_p9 = scmp.lt.s32.totalorder %s4953_s15, %s4946_s11 }
  0x3a   : > { %p4950_p11 = pneg %p4949_p1  ;;  %p4956_p3 = por %p4955_p9, %p4954_p12 }
  0x3c   : > { %p4957_p4 = pnand %p4956_p3, %p4950_p11 }
  0x3e   : > { %4960 = shalt.err (!%p4957_p4)
}
  0x3f   : > { %4847 = dma.hbm_to_vmem [thread:$0]  (!%p5257_p10), %s5266_s24, 16, %s5270_s21, %s5273_s23  }
  0x40   : > { %p5622_p2 = scmp.lt.s32.totalorder %s5125_s20, 5  ;;  %p5623_p5 = scmp.ge.s32.totalorder %s5125_s20, 1 }
  0x41   : > { %s5625_s3 = sld [smem:[#allocation20_spill]]  ;;  %s372_s12 = scalar_lea.vmem [#allocation2], %s5248_s27 }
  0x42   : > { %p5307_p6 = pnand %p5623_p5, %p5622_p2  ;;  %s379_s13 = sshll.u32 %s372_s12, 4  ;;  %s380_s13 = int_to_ptr.vmem [resolvable:$true] %s379_s13 }
  0x43   : > { %s370_s21 = scalar_lea.sflag [#allocation3], %s5248_s27 }
  0x44   : > { %s5624_s22 = scalar_select %p5307_p6, 1, 0 }
  0x47   : > { %s5315_s11 = scalar_lea.hbm %s5625_s3, %s5255_s29  ;;  %s4966_s26 = scalar_lea.hbm %s5625_s3, 32 }
  0x48   : > { %s4961_s24 = scalar_lea.hbm %s5315_s11, 16  ;;  %p4967_p7 = scmp.lt.u32.totalorder %s5315_s11, %s5625_s3 }
  0x49   : > { %p4962_p9 = scmp.ne.s32.totalorder %s5315_s11, %s4961_s24  ;;  %p4968_p8 = scmp.lt.u32.totalorder %s4966_s26, %s4961_s24 }
  0x4a   : > { %p4970_p1 = scmp.lt.u32.totalorder %s4961_s24, %s5315_s11 }
  0x4b   : > { %p4964_p11 = pnand %p4962_p9, %p5279_p0  ;;  %p4969_p13 = por %p4968_p8, %p4967_p7 }
  0x4d   : > { %p4965_p12 = pneg %p4964_p11  ;;  %p4971_p3 = por %p4970_p1, %p4969_p13 }
  0x4f   : > { %p4972_p4 = pnand %p4971_p3, %p4965_p12 }
  0x51   : > { %4975 = shalt.err (!%p4972_p4)
}
  0x52   : > { %s4976_s12 = scalar_lea.vmem %s380_s13, 16  ;;  %s5128_s15 = smov [#allocation2]  }
  0x53   : > { %p4977_p2 = scmp.ne.s32.totalorder %s380_s13, %s4976_s12  ;;  %s4981_s4 = sshll.u32 %s5128_s15, 4  ;;  %s4982_s4 = int_to_ptr.vmem [resolvable:$false] %s4981_s4 }
  0x54   : > { %s4983_s5 = scalar_lea.vmem %s4982_s4, 32  ;;  %p4984_p11 = scmp.lt.s32.totalorder %s380_s13, %s4982_s4 }
  0x55   : > { %p4979_p5 = pnand %p4977_p2, %p5279_p0  ;;  %p4985_p6 = scmp.lt.s32.totalorder %s4983_s5, %s4976_s12 }
  0x57   : > { %p4980_p9 = pneg %p4979_p5  ;;  %p4986_p10 = por %p4985_p6, %p4984_p11 }
  0x59   : > { %p4987_p7 = pnand %p4986_p10, %p4980_p9 }
  0x5b   : > { %4990 = shalt.err (!%p4987_p7)
}
  0x5c   : > { %p5626_p8 = scmp.ne.s32.totalorder %s5619_s30, 0  ;;  %s4058_s8 = sshll.u32 %s5117_s18, 7 }
  0x5d   : > { %s5627_s10 = sshll.u32 %s5248_s27, 3  ;;  %s5628_s6 = sld [smem:[#allocation23_spill]] }
  0x5e   : > { %4844 = dma.hbm_to_vmem [thread:$0]  (!%p5626_p8), %s5315_s11, 16, %s380_s13, %s370_s21  }
  0x5f   : > { %s415_s24 = scalar_lea.vmem [#allocation6], %s5627_s10 }
  0x60   : > { %s422_s26 = sshll.u32 %s415_s24, 4  ;;  %s423_s26 = int_to_ptr.vmem [resolvable:$true] %s422_s26 }
  0x63   : > { %s420_s3 = scalar_lea.hbm %s5628_s6, %s4058_s8  ;;  %s4996_s2 = scalar_lea.hbm %s5628_s6, 256 }
  0x64   : > { %s4991_s4 = scalar_lea.hbm %s420_s3, 128  ;;  %p4997_p13 = scmp.lt.u32.totalorder %s420_s3, %s5628_s6 }
  0x65   : > { %p4992_p6 = scmp.ne.s32.totalorder %s420_s3, %s4991_s4  ;;  %p4998_p1 = scmp.lt.u32.totalorder %s4996_s2, %s4991_s4 }
  0x66   : > { %p5000_p4 = scmp.lt.u32.totalorder %s4991_s4, %s420_s3 }
  0x67   : > { %p4994_p10 = pnand %p4992_p6, %p5279_p0  ;;  %p4999_p3 = por %p4998_p1, %p4997_p13 }
  0x69   : > { %p4995_p12 = pneg %p4994_p10  ;;  %p5001_p2 = por %p5000_p4, %p4999_p3 }
  0x6b   : > { %p5002_p5 = pnand %p5001_p2, %p4995_p12 }
  0x6d   : > { %5005 = shalt.err (!%p5002_p5)
}
  0x6e   : > { %s5006_s13 = scalar_lea.vmem %s423_s26, 128  ;;  %s5129_s21 = smov [#allocation6]  }
  0x6f   : > { %p5007_p9 = scmp.ne.s32.totalorder %s423_s26, %s5006_s13  ;;  %s5011_s8 = sshll.u32 %s5129_s21, 4  ;;  %s5012_s8 = int_to_ptr.vmem [resolvable:$false] %s5011_s8 }
  0x70   : > { %s5013_s10 = scalar_lea.vmem %s5012_s8, 256  ;;  %p5014_p6 = scmp.lt.s32.totalorder %s423_s26, %s5012_s8 }
  0x71   : > { %p5009_p11 = pnand %p5007_p9, %p5279_p0  ;;  %p5015_p10 = scmp.lt.s32.totalorder %s5013_s10, %s5006_s13 }
  0x73   : > { %p5010_p7 = pneg %p5009_p11  ;;  %p5016_p8 = por %p5015_p10, %p5014_p6 }
  0x75   : > { %p5017_p1 = pnand %p5016_p8, %p5010_p7 }
  0x77   : > { %5020 = shalt.err (!%p5017_p1)
}
  0x78   : > { %p5629_p13 = scmp.ne.s32.totalorder %s5619_s30, 0  ;;  %s5360_s24 = scalar_lea.hbm %s5592_s7, %s5255_s29 }
  0x79   : > { %s432_s25 = scalar_lea.vmem [#allocation7], %s5248_s27  ;;  %s430_s4 = scalar_lea.sflag [#allocation8], %s5248_s27 }
  0x7a   : > { %4850 = dma.hbm_to_vmem [thread:$0]  (!%p5629_p13), %s420_s3, 128, %s423_s26, %s5273_s23  }
  0x7b   : > { %s439_s15 = sshll.u32 %s432_s25, 4  ;;  %s5021_s12 = scalar_lea.hbm %s5360_s24, 16  ;;  %s440_s15 = int_to_ptr.vmem [resolvable:$true] %s439_s15 }
  0x7c   : > { %p5022_p8 = scmp.ne.s32.totalorder %s5360_s24, %s5021_s12  ;;  %s5026_s23 = scalar_lea.hbm %s5592_s7, 32 }
  0x7d   : > { %p5027_p4 = scmp.lt.u32.totalorder %s5360_s24, %s5592_s7  ;;  %p5028_p2 = scmp.lt.u32.totalorder %s5026_s23, %s5021_s12 }
  0x7e   : > { %p5024_p12 = pnand %p5022_p8, %p5279_p0  ;;  %p5030_p9 = scmp.lt.u32.totalorder %s5021_s12, %s5360_s24 }
  0x7f   : > { %p5029_p5 = por %p5028_p2, %p5027_p4 }
  0x80   : > { %p5025_p3 = pneg %p5024_p12 }
  0x81   : > { %p5031_p11 = por %p5030_p9, %p5029_p5 }
  0x83   : > { %p5032_p7 = pnand %p5031_p11, %p5025_p3 }
  0x85   : > { %5035 = shalt.err (!%p5032_p7)
}
  0x86   : > { %s5036_s27 = scalar_lea.vmem %s440_s15, 16  ;;  %s5130_s11 = smov [#allocation7]  }
  0x87   : > { %p5037_p6 = scmp.ne.s32.totalorder %s440_s15, %s5036_s27  ;;  %s5041_s13 = sshll.u32 %s5130_s11, 4  ;;  %s5042_s13 = int_to_ptr.vmem [resolvable:$false] %s5041_s13 }
  0x88   : > { %s5043_s21 = scalar_lea.vmem %s5042_s13, 32  ;;  %p5044_p8 = scmp.lt.s32.totalorder %s440_s15, %s5042_s13 }
  0x89   : > { %p5039_p10 = pnand %p5037_p6, %p5279_p0  ;;  %p5045_p12 = scmp.lt.s32.totalorder %s5043_s21, %s5036_s27 }
  0x8b   : > { %p5040_p1 = pneg %p5039_p10  ;;  %p5046_p13 = por %p5045_p12, %p5044_p8 }
  0x8d   : > { %p5047_p2 = pnand %p5046_p13, %p5040_p1 }
  0x8f   : > { %5050 = shalt.err (!%p5047_p2)
}
  0x90   : > { %p5630_p4 = scmp.ne.s32.totalorder %s5619_s30, 0  ;;  %p5631_p3 = scmp.ne.s32.totalorder %s5624_s22, 0 }
  0x91   : > { %s5384_s19 = sand.u32 (!%p5631_p3), 1, %s5101_s14   ;;  %p5632_p0 = scmp.ne.s32.totalorder (!%p5631_p3), %s5618_s28, 0 }
  0x92   : > { %4853 = dma.hbm_to_vmem [thread:$0]  (!%p5630_p4), %s5360_s24, 16, %s440_s15, %s430_s4  }
  0x93   : > { %462 = sbr.rel (%p5631_p3) target bundleno = 2255 (0x8cf), region = 60  ;;  %s465_s8 = scalar_lea.sflag (!%p5631_p3), [#allocation3], %s5384_s19 }
  0x9a   : > { %5084 = dma.done.wait (%p5632_p0), %s465_s8, 16  }
  0x9b   : > { %5086 = vsyncadd (%p5632_p0), %s465_s8, 4294967280  ;;  %s5633_s30 = sadd.s32 4294967295, %s5125_s20  }
  0x9c   : > { %s472_s2 = sand.u32 1, %s5633_s30  }
  0x9d   : > { %s473_s22 = scalar_lea.sflag [#allocation5], %s472_s2 }
  0x9e   : > { %5088 = dma.done.wait (%p5632_p0), %s473_s22, 144  }
  0x9f   : > { %5090 = vsyncadd (%p5632_p0), %s473_s22, 4294967152  ;;  %s4061_s24 = sshll.u32 %s5384_s19, 3  ;;  %s490_s15 = scalar_lea.sflag [#allocation8], %s5384_s19 }
  0xa0   : > { %s484_s25 = scalar_lea.vmem [#allocation6], %s4061_s24 }
  0xa1   : > { %5092 = dma.done.wait (%p5632_p0), %s490_s15, 16  }
  0xa2   : > { %5094 = vsyncadd (%p5632_p0), %s490_s15, 4294967280  ;;  %p569_p13 = scmp.lt.s32.totalorder %s5113_s17, 1  ;;  %p579_p5 = scmp.lt.s32.totalorder %s5109_s16, 1 }
  0xa3   : > { %s5634_s0 = sld [smem:[#allocation17_spill]]  ;;  %s5635_s1 = sld [smem:[#allocation18_spill]] }
  0xa4   : > { %s5662_s17 = smov (!%p569_p13, %s5113_s17), 1  ;;  %s5636_s8 = sld [smem:[#allocation25_spill]] }
  0xa5   : > { %s5410_s12 = scalar_select %p579_p5, %s5109_s16, 1 }
  0xa6   : > { %s4081_s5 = sshll.u32 %s5662_s17, 4  ;;  %s5637_s24 = sld [smem:[#allocation19_spill]] }
  0xa7   : > { %s4083_s11 = sshll.u32 %s5410_s12, 5  ;;  %s5638_s10 = sld [smem:[#allocation21_spill]] }
  0xa8   : > { %s5640_s6 = sld [smem:[#allocation26_spill]]  ;;  %p4074_p9 = scmp.ne.s32.totalorder %s5109_s16, 0 }
  0xa9   : > { %s573_s26 = scalar_lea.vmem %s5634_s0, %s4081_s5  ;;  %s578_s28 = scalar_lea.vmem %s5635_s1, %s4081_s5  ;;  %vm608_vm0 = vcmask (!%p4074_p9), 261120  }
  0xaa   : > { %s596_s30 = scalar_lea.vmem %s5636_s8, %s5410_s12  ;;  %s5639_s0 = sld [smem:[#allocation24_spill]]  ;;  %v606_v0 = vld [vmem:[%s573_s26] sm:$0xff] (!%p4074_p9)  ;;  %v607_v1 = vld [vmem:[%s573_s26 + $0x8] sm:$0xff] (!%p4074_p9) }
  0xab   : > { %605 = sbr.rel (%p4074_p9) target bundleno = 178 (0xb2), region = 80 }
  0xac   : > { %s5426_s15 = scalar_lea.vmem %s5637_s24, %s4083_s11 }
  0xad   : > { %s5431_s4 = scalar_lea.vmem %s5638_s10, %s4083_s11 }
  0xae   : > { %s5441_s13 = scalar_lea.vmem %s5640_s6, %s4081_s5 }
  0xaf   : > { %609 = vst.msk [vmem:[%s5441_s13] sm:$0xff] (!%p4074_p9), %vm608_vm0, %v606_v0  ;;  %610 = vst.msk [vmem:[%s5441_s13 + $0x8] sm:$0xff] (!%p4074_p9), %vm608_vm0, %v607_v1 }
  0xb0   : > { %s5436_s29 = scalar_lea.vmem %s5639_s0, %s4083_s11 }
  0xb2 PF: > { %v615_v2 = vld [vmem:[%s484_s25] sm:$0xff]  ;;  %vm623_vm1 = vcmask 64512   ;;  %v1124_v30 = vld [vmem:[%s5436_s29 + $0x18] sm:$0xff]  ;;  %s5641_s0 = scalar_lea.vmem [#allocation7], %s5384_s19  ;;  %vm1132_vm2 = vcmask 261120   ;;  %s5643_s10 = scalar_lea.vmem [#allocation2], %s5384_s19 }
  0xb3   : > { %v613_v3 = vld [vmem:[%s578_s28] sm:$0xff]  ;;  %v614_v4 = vld [vmem:[%s578_s28 + $0x8] sm:$0xff]  ;;  %v631_v5 = vand.u32 4294901760, %v615_v2  ;;  %v1123_v29 = vld [vmem:[%s5436_s29 + $0x10] sm:$0xff]  ;;  %v1149_v32 = vand.u32 4294901760, %v1124_v30  ;;  %s5131_s9 = smov 96  }
  0xb4   : > { %v625_v6 = vsel %vm623_vm1, %v613_v3, 0  ;;  %v628_v7 = vsel %vm623_vm1, %v614_v4, 0  ;;  %v1121_v22 = vld [vmem:[%s5436_s29] sm:$0xff]  ;;  %v1122_v23 = vld [vmem:[%s5436_s29 + $0x8] sm:$0xff]  ;;  %v1146_v31 = vand.u32 4294901760, %v1123_v29  ;;  %vm2730_vm3 = vcmask 130048  }
  0xb5   : > { %v696_v8 = vand.u32 4294901760, %v625_v6  ;;  %v706_v9 = vand.u32 4294901760, %v628_v7  ;;  %4261 = vmatprep.subr.mxu0 %v631_v5  ;;  %v718_v10 = vsub.f32 %v615_v2, %v631_v5  ;;  %v1140_v24 = vand.u32 4294901760, %v1121_v22  ;;  %v4075_v54 = vld [vmem:[%s5641_s0] ss:$0 sm:$0xff]  ;;  %s5132_s25 = smov 64  }
  0xb6   : > { %4262 = vmatpush3.msra.mxu0 %v631_v5  ;;  %v1143_v25 = vand.u32 4294901760, %v1122_v23  ;;  %v5454_v35 = vpack.c.bf16 %v1149_v32, %v1146_v31  ;;  %v1244_v38 = vsub.f32 %v1123_v29, %v1146_v31  ;;  %v1251_v39 = vsub.f32 %v1124_v30, %v1149_v32 }
  0xb7   : > { %v697_v11 = vsub.f32 %v625_v6, %v696_v8  ;;  %v707_v12 = vsub.f32 %v628_v7, %v706_v9  ;;  %v719_v13 = vand.u32 4294901760, %v718_v10  ;;  %v1230_v27 = vsub.f32 %v1121_v22, %v1140_v24 }
  0xb8   : > { %v5448_v26 = vpack.c.bf16 %v1143_v25, %v1140_v24  ;;  %v1237_v28 = vsub.f32 %v1122_v23, %v1143_v25  ;;  %v1245_v42 = vand.u32 4294901760, %v1244_v38  ;;  %v1252_v43 = vand.u32 4294901760, %v1251_v39 }
  0xb9   : > { %v698_v14 = vand.u32 4294901760, %v697_v11  ;;  %v708_v15 = vand.u32 4294901760, %v707_v12  ;;  %v720_v16 = vsub.f32 %v718_v10, %v719_v13  ;;  %v1231_v33 = vand.u32 4294901760, %v1230_v27 }
  0xba   : > { %4574 = vmatprep.subr.bf16.mxu1 %v5448_v26  ;;  %v1238_v34 = vand.u32 4294901760, %v1237_v28  ;;  %v1246_v45 = vsub.f32 %v1244_v38, %v1245_v42  ;;  %v1253_v46 = vsub.f32 %v1251_v39, %v1252_v43  ;;  %v4589_v50 = vpack.c.bf16 %v1237_v28, %v1230_v27 }
  0xbb   : > { %v699_v17 = vsub.f32 %v697_v11, %v698_v14  ;;  %v709_v18 = vsub.f32 %v707_v12, %v708_v15  ;;  %v721_v19 = vand.u32 4294901760, %v720_v16  ;;  %4576 = vmatpush3.bf16.msra.mxu1 %v5448_v26  ;;  %v1232_v36 = vsub.f32 %v1230_v27, %v1231_v33 }
  0xbc   : > { %v1239_v37 = vsub.f32 %v1237_v28, %v1238_v34  ;;  %4578 = vmatprep.subr.bf16.mxu1 %v5454_v35  ;;  %v1247_v47 = vand.u32 4294901760, %v1246_v45  ;;  %v1254_v48 = vand.u32 4294901760, %v1253_v46  ;;  %v4593_v51 = vpack.c.bf16 %v1251_v39, %v1244_v38  ;;  %v5495_v45 = vld [vmem:[%s5441_s13] sm:$0xff] }
  0xbd   : > { %v700_v20 = vand.u32 4294901760, %v699_v17  ;;  %v710_v21 = vand.u32 4294901760, %v709_v18  ;;  %4266 = vmatprep.subr.mxu0 %v721_v19  ;;  %v1233_v40 = vand.u32 4294901760, %v1232_v36  ;;  %v4605_v52 = vpack.c.bf16 %v1238_v34, %v1231_v33 }
  0xbe   : > { %v1240_v41 = vand.u32 4294901760, %v1239_v37  ;;  %v4585_v49 = vpack.c.bf16 %v1254_v48, %v1247_v47  ;;  %v4609_v53 = vpack.c.bf16 %v1252_v43, %v1245_v42  ;;  %v5492_v42 = vld [vmem:[%s5441_s13 + $0x8] sm:$0xff] }
  0xbf   : > { %4263 = vmatprep.mubr.f32.mxu0 %v700_v20  ;;  %4580 = vmatpush3.bf16.msra.mxu1 %v5454_v35 }
  0xc0   : > { %4264 = vmatmul.mubr.f32.vlgmr.msra.gmra.mrb[0].mxu0 %v710_v21  ;;  %v4581_v44 = vpack.c.bf16 %v1240_v41, %v1233_v40  ;;  %v4076_v41 = vld [vmem:[%s596_s30] ss:$0 sm:$0xff] }
  0xc1   : > { %4267 = vmatpush3.msra.mxu0 %v721_v19  ;;  %4268 = vmatprep.mubr.f32.mxu0 %v696_v8 }
  0xc2   : > { %4271 = vmatprep.subr.mxu0 %v718_v10  ;;  %4582 = vmatprep.subr.bf16.mxu1 %v4581_v44 }
  0xc8   : > { %4269 = vmatmul.mubr.f32.vlgmr.msra.gmra.mrb[0].mxu0 %v706_v9 }
  0xc9   : > { %4272 = vmatpush3.msra.mxu0 %v718_v10  ;;  %4273 = vmatprep.mubr.f32.mxu0 %v697_v11  ;;  %v1670_v10 = vld [vmem:[%s5426_s15 + $0x8] sm:$0xff] }
  0xca   : > { %4276 = vmatprep.subr.mxu0 %v631_v5 }
  0xd0   : > { %4274 = vmatmul.mubr.f32.vlgmr.msra.gmra.mrb[0].mxu0 %v707_v12  ;;  %v1690_v12 = vand.u32 4294901760, %v1670_v10 }
  0xd1   : > { %4277 = vmatpush3.msra.mxu0 %v631_v5  ;;  %4278 = vmatprep.mubr.f32.mxu0 %v698_v14  ;;  %v1671_v14 = vld [vmem:[%s5426_s15 + $0x10] sm:$0xff] }
  0xd2   : > { %4281 = vmatprep.subr.mxu0 %v719_v13  ;;  %v1693_v16 = vand.u32 4294901760, %v1671_v14  ;;  %v1784_v20 = vsub.f32 %v1670_v10, %v1690_v12 }
  0xd4   : > { %v1785_v22 = vand.u32 4294901760, %v1784_v20 }
  0xd6   : > { %v1786_v25 = vsub.f32 %v1784_v20, %v1785_v22 }
  0xd8   : > { %4279 = vmatmul.mubr.f32.vlgmr.msra.gmra.mrb[0].mxu0 %v708_v15  ;;  %v1672_v15 = vld [vmem:[%s5426_s15 + $0x18] sm:$0xff]  ;;  %v1787_v29 = vand.u32 4294901760, %v1786_v25 }
  0xd9   : > { %4282 = vmatpush3.msra.mxu0 %v719_v13  ;;  %4283 = vmatprep.mubr.f32.mxu0 %v696_v8  ;;  %v1696_v17 = vand.u32 4294901760, %v1672_v15 }
  0xda   : > { %4286 = vmatprep.subr.mxu0 %v631_v5 }
  0xdb   : > { %v5480_v18 = vpack.c.bf16 %v1696_v17, %v1693_v16  ;;  %v1798_v27 = vsub.f32 %v1672_v15, %v1696_v17 }
  0xdd   : > { %v1799_v31 = vand.u32 4294901760, %v1798_v27 }
  0xe0   : > { %4284 = vmatmul.mubr.f32.vlgmr.msra.gmra.mrb[0].mxu0 %v706_v9 }
  0xe1   : > { %4287 = vmatpush3.msra.mxu0 %v631_v5  ;;  %4288 = vmatprep.mubr.f32.mxu0 %v696_v8 }
  0xe8   : > { %4289 = vmatmul.mubr.f32.vlgmr.msra.gmra.mrb[0].mxu0 %v706_v9  ;;  %v1669_v9 = vld [vmem:[%s5426_s15] sm:$0xff] }
  0xe9   : > { %v1687_v11 = vand.u32 4294901760, %v1669_v9 }
  0xeb   : > { %v5472_v13 = vpack.c.bf16 %v1690_v12, %v1687_v11  ;;  %v1777_v19 = vsub.f32 %v1669_v9, %v1687_v11 }
  0xed   : > { %4646 = vmatprep.subr.bf16.mxu0 %v5472_v13  ;;  %v1778_v21 = vand.u32 4294901760, %v1777_v19  ;;  %v4637_v39 = vpack.c.bf16 %v1784_v20, %v1777_v19 }
  0xee   : > { %4648 = vmatpush3.bf16.msra.mxu0 %v5472_v13 }
  0xef   : > { %4650 = vmatprep.subr.bf16.mxu0 %v5480_v18  ;;  %v4653_v23 = vpack.c.bf16 %v1785_v22, %v1778_v21  ;;  %v1779_v24 = vsub.f32 %v1777_v19, %v1778_v21 }
  0xf1   : > { %v1780_v28 = vand.u32 4294901760, %v1779_v24 }
  0xf2   : > { %4652 = vmatpush3.bf16.msra.mxu0 %v5480_v18 }
  0xf3   : > { %4654 = vmatprep.subr.bf16.mxu0 %v4653_v23  ;;  %v4629_v32 = vpack.c.bf16 %v1787_v29, %v1780_v28 }
 0x1bb   : > { %v4290_v55 = vpop.f32.mrb[0].mxu0 }
 0x1bc   : > { %v4765_v56 = vadd.f32 %v4290_v55, %v4075_v54  ;;  %v1109_v57 = vpop.f32.mrb[1].mxu0 }
 0x1bd   : > { %v4766_v58 = vadd.f32 %v4075_v54, %v1109_v57 }
 0x1be   : > { %v1120_v59 = vmax.f32 %v4765_v56, 0.0 }
 0x1bf   : > { %v1119_v60 = vmax.f32 %v4766_v58, 0.0 }
 0x1c0   : > { %v1137_v61 = vsel %vm1132_vm2, %v1120_v59, 0 }
 0x1c1   : > { %v1218_v62 = vand.u32 4294901760, %v1137_v61  ;;  %v1134_v63 = vsel %vm1132_vm2, %v1119_v60, 0 }
 0x1c2   : > { %v1208_v0 = vand.u32 4294901760, %v1134_v63 }
 0x1c3   : > { %v1219_v1 = vsub.f32 %v1137_v61, %v1218_v62 }
 0x1c4   : > { %v1209_v2 = vsub.f32 %v1134_v63, %v1208_v0 }
 0x1c5   : > { %v1220_v3 = vand.u32 4294901760, %v1219_v1 }
 0x1c6   : > { %v1210_v4 = vand.u32 4294901760, %v1209_v2 }
 0x1c7   : > { %v1221_v5 = vsub.f32 %v1219_v1, %v1220_v3 }
 0x1c8   : > { %v1211_v6 = vsub.f32 %v1209_v2, %v1210_v4 }
 0x1c9   : > { %v1222_v8 = vand.u32 4294901760, %v1221_v5 }
 0x1ca   : > { %v1212_v7 = vand.u32 4294901760, %v1211_v6 }
 0x1cc   : > { %4299 = vmatprep.mubr.f32.mxu1 %v1212_v7 }
 0x1cd   : > { %4300 = vmatmul.mubr.f32.vlgmr.msra.gmra.mrb[0].mxu1 %v1222_v8 }
 0x1ce   : > { %4584 = vmatpush3.bf16.msra.mxu1 %v4581_v44  ;;  %4310 = vmatprep.mubr.f32.mxu1 %v1208_v0 }
 0x1cf   : > { %4586 = vmatprep.subr.bf16.mxu1 %v4585_v49 }
 0x1d2   : > { %4588 = vmatpush3.bf16.msra.mxu1 %v4585_v49 }
 0x1d3   : > { %4590 = vmatprep.subr.bf16.mxu1 %v4589_v50 }
 0x1d5   : > { %4311 = vmatmul.mubr.f32.vlgmr.msra.gmra.mrb[0].mxu1 %v1218_v62 }
 0x1d6   : > { %4592 = vmatpush3.bf16.msra.mxu1 %v4589_v50  ;;  %4321 = vmatprep.mubr.f32.mxu1 %v1209_v2 }
 0x1d7   : > { %4594 = vmatprep.subr.bf16.mxu1 %v4593_v51 }
 0x1da   : > { %4596 = vmatpush3.bf16.msra.mxu1 %v4593_v51 }
 0x1db   : > { %4598 = vmatprep.subr.bf16.mxu1 %v5448_v26 }
 0x1dd   : > { %4322 = vmatmul.mubr.f32.vlgmr.msra.gmra.mrb[0].mxu1 %v1219_v1 }
 0x1de   : > { %4600 = vmatpush3.bf16.msra.mxu1 %v5448_v26  ;;  %4332 = vmatprep.mubr.f32.mxu1 %v1210_v4 }
 0x1df   : > { %4602 = vmatprep.subr.bf16.mxu1 %v5454_v35 }
 0x1e2   : > { %4604 = vmatpush3.bf16.msra.mxu1 %v5454_v35 }
 0x1e3   : > { %4606 = vmatprep.subr.bf16.mxu1 %v4605_v52 }
 0x1e5   : > { %4333 = vmatmul.mubr.f32.vlgmr.msra.gmra.mrb[0].mxu1 %v1220_v3 }
 0x1e6   : > { %4608 = vmatpush3.bf16.msra.mxu1 %v4605_v52  ;;  %4343 = vmatprep.mubr.f32.mxu1 %v1208_v0 }
 0x1e7   : > { %4610 = vmatprep.subr.bf16.mxu1 %v4609_v53 }
 0x1ea   : > { %4612 = vmatpush3.bf16.msra.mxu1 %v4609_v53 }
 0x1eb   : > { %4614 = vmatprep.subr.bf16.mxu1 %v5448_v26 }
 0x1ed   : > { %4344 = vmatmul.mubr.f32.vlgmr.msra.gmra.mrb[0].mxu1 %v1218_v62 }
 0x1ee   : > { %4616 = vmatpush3.bf16.msra.mxu1 %v5448_v26  ;;  %4354 = vmatprep.mubr.f32.mxu1 %v1208_v0  ;;  %v1791_v26 = vsub.f32 %v1671_v14, %v1693_v16  ;;  %v4077_v0 = vld [vmem:[%s5643_s10] ss:$0 sm:$0xff] }
 0x1ef   : > { %4618 = vmatprep.subr.bf16.mxu1 %v5454_v35 }
 0x1f0   : > { %v1792_v30 = vand.u32 4294901760, %v1791_v26  ;;  %v4641_v40 = vpack.c.bf16 %v1798_v27, %v1791_v26 }
 0x1f2   : > { %4620 = vmatpush3.bf16.msra.mxu1 %v5454_v35  ;;  %v4657_v33 = vpack.c.bf16 %v1799_v31, %v1792_v30  ;;  %v1793_v34 = vsub.f32 %v1791_v26, %v1792_v30  ;;  %v1800_v35 = vsub.f32 %v1798_v27, %v1799_v31 }
 0x1f3   : > { %4622 = vmatprep.subr.bf16.mxu1 %v5472_v13 }
 0x1f4   : > { %v1794_v36 = vand.u32 4294901760, %v1793_v34  ;;  %v1801_v37 = vand.u32 4294901760, %v1800_v35 }
 0x1f5   : > { %4355 = vmatmul.mubr.f32.vlgmr.msra.gmra.mrb[0].mxu1 %v1218_v62 }
 0x1f6   : > { %4624 = vmatpush3.bf16.msra.mxu1 %v5472_v13  ;;  %v4633_v38 = vpack.c.bf16 %v1801_v37, %v1794_v36 }
 0x1f7   : > { %4626 = vmatprep.subr.bf16.mxu1 %v5480_v18 }
 0x1fa   : > { %4628 = vmatpush3.bf16.msra.mxu1 %v5480_v18 }
 0x1fb   : > { %4630 = vmatprep.subr.bf16.mxu1 %v4629_v32 }
 0x2c8   : > { %v4356_v43 = vpop.f32.mrb[0].mxu1 }
 0x2c9   : > { %v4767_v44 = vadd.f32 %v4356_v43, %v4076_v41  ;;  %v1657_v46 = vpop.f32.mrb[1].mxu1 }
 0x2ca   : > { %v4768_v47 = vadd.f32 %v4076_v41, %v1657_v46 }
 0x2cb   : > { %v1668_v48 = vadd.f32 %v4767_v44, %v5492_v42 }
 0x2cc   : > { %v1667_v49 = vadd.f32 %v4768_v47, %v5495_v45 }
 0x2cd   : > { %v1684_v50 = vsel %vm1132_vm2, %v1668_v48, 0 }
 0x2ce   : > { %v1765_v51 = vand.u32 4294901760, %v1684_v50  ;;  %v1681_v52 = vsel %vm1132_vm2, %v1667_v49, 0 }
 0x2cf   : > { %v1755_v53 = vand.u32 4294901760, %v1681_v52 }
 0x2d0   : > { %v1766_v54 = vsub.f32 %v1684_v50, %v1765_v51 }
 0x2d1   : > { %v1756_v55 = vsub.f32 %v1681_v52, %v1755_v53 }
 0x2d2   : > { %v1767_v56 = vand.u32 4294901760, %v1766_v54 }
 0x2d3   : > { %v1757_v57 = vand.u32 4294901760, %v1756_v55 }
 0x2d4   : > { %v1768_v58 = vsub.f32 %v1766_v54, %v1767_v56 }
 0x2d5   : > { %4398 = vmatprep.mubr.f32.mxu0 %v1757_v57  ;;  %v1758_v59 = vsub.f32 %v1756_v55, %v1757_v57 }
 0x2d6   : > { %4399 = vmatmul.mubr.f32.vlgmr.msra.gmra.mrb[2].mxu0 %v1767_v56  ;;  %v1769_v61 = vand.u32 4294901760, %v1768_v58 }
 0x2d7   : > { %4656 = vmatpush3.bf16.msra.mxu0 %v4653_v23  ;;  %4409 = vmatprep.mubr.f32.mxu0 %v1755_v53  ;;  %v1759_v60 = vand.u32 4294901760, %v1758_v59 }
 0x2d8   : > { %4658 = vmatprep.subr.bf16.mxu0 %v4657_v33 }
 0x2d9   : > { %4365 = vmatprep.mubr.f32.mxu1 %v1759_v60 }
 0x2da   : > { %4366 = vmatmul.mubr.f32.vlgmr.msra.gmra.mrb[2].mxu1 %v1769_v61 }
 0x2db   : > { %4632 = vmatpush3.bf16.msra.mxu1 %v4629_v32  ;;  %4376 = vmatprep.mubr.f32.mxu1 %v1755_v53 }
 0x2dc   : > { %4660 = vmatpush3.bf16.msra.mxu0 %v4657_v33  ;;  %4634 = vmatprep.subr.bf16.mxu1 %v4633_v38 }
 0x2dd   : > { %4662 = vmatprep.subr.bf16.mxu0 %v5472_v13 }
 0x2df   : > { %4410 = vmatmul.mubr.f32.vlgmr.msra.gmra.mrb[2].mxu0 %v1765_v51  ;;  %4636 = vmatpush3.bf16.msra.mxu1 %v4633_v38 }
 0x2e0   : > { %4664 = vmatpush3.bf16.msra.mxu0 %v5472_v13  ;;  %4420 = vmatprep.mubr.f32.mxu0 %v1755_v53 }
 0x2e1   : > { %4638 = vmatprep.subr.bf16.mxu1 %v4637_v39  ;;  %4666 = vmatprep.subr.bf16.mxu0 %v5480_v18 }
 0x2e2   : > { %4377 = vmatmul.mubr.f32.vlgmr.msra.gmra.mrb[2].mxu1 %v1765_v51 }
 0x2e3   : > { %4640 = vmatpush3.bf16.msra.mxu1 %v4637_v39  ;;  %4387 = vmatprep.mubr.f32.mxu1 %v1756_v55 }
 0x2e4   : > { %4668 = vmatpush3.bf16.msra.mxu0 %v5480_v18  ;;  %4642 = vmatprep.subr.bf16.mxu1 %v4641_v40 }
 0x2e7   : > { %4421 = vmatmul.mubr.f32.vlgmr.msra.gmra.mrb[2].mxu0 %v1765_v51  ;;  %4644 = vmatpush3.bf16.msra.mxu1 %v4641_v40 }
 0x2ea   : > { %4388 = vmatmul.mubr.f32.vlgmr.msra.gmra.mrb[2].mxu1 %v1766_v54 }
 0x3ba   : > { %v4422_v62 = vpop.f32.mrb[2].mxu0 }
 0x3bb   : > { %v2204_v63 = vpop.f32.mrb[3].mxu0 }
 0x3bd   : > { %v4389_v1 = vpop.f32.mrb[2].mxu1 }
 0x3be   : > { %v4769_v2 = vadd.f32 %v4389_v1, %v4077_v0  ;;  %v1948_v3 = vpop.f32.mrb[3].mxu1 }
 0x3bf   : > { %v4771_v4 = vadd.f32 %v4077_v0, %v1948_v3 }
 0x3c0   : > { %v5507_v5 = vadd.f32 %v4769_v2, %v4422_v62 }
 0x3c1   : > { %v5509_v6 = vadd.f32 %v4771_v4, %v2204_v63 }
 0x3c2   : > { %v2222_v13 = vsel %vm1132_vm2, %v5507_v5, 0 }
 0x3c3   : > { %v2220_v7 = vsel %vm1132_vm2, %v5509_v6, 0  ;;  %2216 = vrot.lane.b32.xlu0 %v5509_v6, %s5131_s9  ;;  %v2305_v14 = vand.u32 4294901760, %v2222_v13 }
 0x3c4   : > { %v2295_v8 = vand.u32 4294901760, %v2220_v7 }
 0x3c5   : > { %v2306_v18 = vsub.f32 %v2222_v13, %v2305_v14 }
 0x3c6   : > { %v2296_v9 = vsub.f32 %v2220_v7, %v2295_v8 }
 0x3c7   : > { %2218 = vrot.lane.b32.xlu0 %v5507_v5, %s5131_s9  ;;  %v2307_v26 = vand.u32 4294901760, %v2306_v18 }
 0x3c8   : > { %v2297_v10 = vand.u32 4294901760, %v2296_v9 }
 0x3c9   : > { %v2308_v30 = vsub.f32 %v2306_v18, %v2307_v26 }
 0x3ca   : > { %v2298_v11 = vsub.f32 %v2296_v9, %v2297_v10 }
 0x3cb   : > { %v2309_v33 = vand.u32 4294901760, %v2308_v30  ;;  %v3269_v30 = vld [vmem:[%s5431_s4 + $0x10] sm:$0xff] }
 0x3cc   : > { %v2299_v12 = vand.u32 4294901760, %v2298_v11 }
 0x3ce   : > { %4427 = vmatprep.mubr.f32.mxu1 %v2299_v12 }
 0x435   : > { %v2217_v15 = vpop.permute.xlu0 %2216 }
 0x436   : > { %v2224_v16 = vsel %vm1132_vm2, %v2217_v15, 0 }
 0x437   : > { %v2229_v17 = vand.u32 4294901760, %v2224_v16 }
 0x439   : > { %v2317_v19 = vsub.f32 %v2224_v16, %v2229_v17  ;;  %v2219_v20 = vpop.permute.xlu0 %2218 }
 0x43a   : > { %v2226_v21 = vsel %vm1132_vm2, %v2219_v20, 0 }
 0x43b   : > { %v2318_v22 = vand.u32 4294901760, %v2317_v19  ;;  %v2232_v23 = vand.u32 4294901760, %v2226_v21 }
 0x43d   : > { %v4669_v24 = vpack.c.bf16 %v2232_v23, %v2229_v17  ;;  %v2324_v25 = vsub.f32 %v2226_v21, %v2232_v23  ;;  %v2319_v27 = vsub.f32 %v2317_v19, %v2318_v22  ;;  %v3267_v23 = vld [vmem:[%s5431_s4] sm:$0xff] }
 0x43f   : > { %v2325_v28 = vand.u32 4294901760, %v2324_v25  ;;  %4670 = vmatprep.subr.bf16.mxu1 %v4669_v24  ;;  %v2320_v31 = vand.u32 4294901760, %v2319_v27  ;;  %v4677_v35 = vpack.c.bf16 %v2324_v25, %v2317_v19 }
 0x440   : > { %4672 = vmatpush3.bf16.xpose.msra.mxu1 %v4669_v24 }
 0x441   : > { %v2326_v29 = vsub.f32 %v2324_v25, %v2325_v28  ;;  %v4685_v36 = vpack.c.bf16 %v2325_v28, %v2318_v22  ;;  %v3285_v25 = vand.u32 4294901760, %v3267_v23 }
 0x443   : > { %v2327_v32 = vand.u32 4294901760, %v2326_v29  ;;  %v3375_v28 = vsub.f32 %v3267_v23, %v3285_v25 }
 0x445   : > { %v4673_v34 = vpack.c.bf16 %v2327_v32, %v2320_v31  ;;  %v3270_v31 = vld [vmem:[%s5431_s4 + $0x18] sm:$0xff]  ;;  %v3291_v32 = vand.u32 4294901760, %v3269_v30 }
 0x447   : > { %4428 = vmatmul.mubr.f32.vlgmr.msra.gmra.mrb[4].mxu1 %v2309_v33  ;;  %4674 = vmatprep.subr.bf16.mxu1 %v4673_v34  ;;  %v3294_v33 = vand.u32 4294901760, %v3270_v31 }
 0x448   : > { %4676 = vmatpush3.bf16.xpose.msra.mxu1 %v4673_v34  ;;  %4434 = vmatprep.mubr.f32.mxu1 %v2295_v8  ;;  %v3376_v34 = vand.u32 4294901760, %v3375_v28 }
 0x449   : > { %4678 = vmatprep.subr.bf16.mxu1 %v4677_v35 }
 0x44f   : > { %4435 = vmatmul.mubr.f32.vlgmr.msra.gmra.mrb[4].mxu1 %v2305_v14 }
 0x450   : > { %4680 = vmatpush3.bf16.xpose.msra.mxu1 %v4677_v35  ;;  %4441 = vmatprep.mubr.f32.mxu1 %v2296_v9 }
 0x451   : > { %4682 = vmatprep.subr.bf16.mxu1 %v4669_v24 }
 0x457   : > { %4442 = vmatmul.mubr.f32.vlgmr.msra.gmra.mrb[4].mxu1 %v2306_v18 }
 0x458   : > { %4684 = vmatpush3.bf16.xpose.msra.mxu1 %v4669_v24  ;;  %4448 = vmatprep.mubr.f32.mxu1 %v2297_v10 }
 0x459   : > { %4686 = vmatprep.subr.bf16.mxu1 %v4685_v36 }
 0x45f   : > { %4449 = vmatmul.mubr.f32.vlgmr.msra.gmra.mrb[4].mxu1 %v2307_v26 }
 0x460   : > { %4688 = vmatpush3.bf16.xpose.msra.mxu1 %v4685_v36  ;;  %4455 = vmatprep.mubr.f32.mxu1 %v2295_v8  ;;  %v5535_v36 = vpack.c.bf16 %v3294_v33, %v3291_v32 }
 0x461   : > { %4690 = vmatprep.subr.bf16.mxu1 %v4669_v24 }
 0x467   : > { %4456 = vmatmul.mubr.f32.vlgmr.msra.gmra.mrb[4].mxu1 %v2305_v14 }
 0x468   : > { %4692 = vmatpush3.bf16.xpose.msra.mxu1 %v4669_v24  ;;  %4462 = vmatprep.mubr.f32.mxu1 %v2295_v8  ;;  %v3268_v24 = vld [vmem:[%s5431_s4 + $0x8] sm:$0xff]  ;;  %s5644_s4 = scalar_lea.vmem [#allocation4], %s5384_s19 }
 0x469   : > { %v3288_v26 = vand.u32 4294901760, %v3268_v24 }
 0x46b   : > { %v5529_v27 = vpack.c.bf16 %v3288_v26, %v3285_v25  ;;  %v3382_v29 = vsub.f32 %v3268_v24, %v3288_v26 }
 0x46d   : > { %v3383_v35 = vand.u32 4294901760, %v3382_v29 }
 0x46f   : > { %4463 = vmatmul.mubr.f32.vlgmr.msra.gmra.mrb[4].mxu1 %v2305_v14 }
 0x542   : > { %v4464_v37 = vpop.f32.mrb[4].mxu1 }
 0x543   : > { %v2720_v38 = vpop.f32.mrb[5].mxu1  ;;  %v2734_v40 = vsel %vm2730_vm3, %v4464_v37, -inf }
 0x544   : > { %v2731_v39 = vsel %vm2730_vm3, %v2720_v38, -inf }
 0x545   : > { %2732 = vmax.xlane.f32.xlu1 %v2731_v39  ;;  %v3389_v39 = vsub.f32 %v3269_v30, %v3291_v32 }
 0x549   : > { %2735 = vmax.xlane.f32.xlu1 %v2734_v40  ;;  %v3396_v40 = vsub.f32 %v3270_v31, %v3294_v33 }
 0x5d2   : > { %v2733_v41 = vpop.xlane.xlu1 %2732 }
 0x5d3   : > { %v2737_v43 = vsub.f32 %v2720_v38, %v2733_v41  ;;  %v3384_v38 = vsub.f32 %v3382_v29, %v3383_v35 }
 0x5d5   : > { %v2739_v44 = vmul.f32 1.442695, %v2737_v43  ;;  %v3385_v43 = vand.u32 4294901760, %v3384_v38 }
 0x5d6   : > { %v2736_v46 = vpop.xlane.xlu1 %2735 }
 0x5d7   : > { %4921 = vpow2.f32 %v2739_v44  ;;  %v2738_v47 = vsub.f32 %v4464_v37, %v2736_v46  ;;  %v3377_v37 = vsub.f32 %v3375_v28, %v3376_v34  ;;  %v3390_v44 = vand.u32 4294901760, %v3389_v39 }
 0x5d8   : > { %v3397_v46 = vand.u32 4294901760, %v3396_v40 }
 0x5d9   : > { %v2741_v48 = vmul.f32 1.442695, %v2738_v47  ;;  %v3378_v41 = vand.u32 4294901760, %v3377_v37 }
 0x5db   : > { %4923 = vpow2.f32 %v2741_v48  ;;  %v4725_v47 = vpack.c.bf16 %v3385_v43, %v3378_v41  ;;  %v3391_v48 = vsub.f32 %v3389_v39, %v3390_v44 }
 0x5e1   : > { %v4922_v49 = vpop.eup %4921 }
 0x5e2   : > { %v2743_v50 = vsel %vm2730_vm3, %v4922_v49, 0.0 }
 0x5e3   : > { %2744 = vadd.xlane.f32.xlu0 %v2743_v50  ;;  %v3392_v50 = vand.u32 4294901760, %v3391_v48 }
 0x5e5   : > { %v4924_v51 = vpop.eup %4923 }
 0x5e6   : > { %v2746_v52 = vsel %vm2730_vm3, %v4924_v51, 0.0 }
 0x5e7   : > { %2747 = vadd.xlane.f32.xlu1 %v2746_v52 }
 0x5f8   : > { %2753 = vrot.lane.b32.xlu1 %v5509_v6, %s5132_s25 }
 0x5fc   : > { %2755 = vrot.lane.b32.xlu1 %v5507_v5, %s5132_s25 }
 0x670   : > { %v2745_v53 = vpop.xlane.xlu0 %2744 }
 0x671   : > { %4925 = vrcp.f32 %v2745_v53  ;;  %v4733_v53 = vpack.c.bf16 %v3382_v29, %v3375_v28 }
 0x674   : > { %v2748_v54 = vpop.xlane.xlu1 %2747 }
 0x675   : > { %4927 = vrcp.f32 %v2748_v54  ;;  %v4737_v54 = vpack.c.bf16 %v3396_v40, %v3389_v39 }
 0x678   : > { %v2754_v55 = vpop.permute.xlu1 %2753 }
 0x679   : > { %v2766_v56 = vand.u32 4294901760, %v2754_v55 }
 0x67b   : > { %v4926_v57 = vpop.eup %4925  ;;  %v2854_v58 = vsub.f32 %v2754_v55, %v2766_v56  ;;  %v4749_v55 = vpack.c.bf16 %v3383_v35, %v3376_v34 }
 0x67c   : > { %v2750_v59 = vmul.f32 %v4926_v57, %v4922_v49  ;;  %v2756_v60 = vpop.permute.xlu1 %2755  ;;  %v3398_v49 = vsub.f32 %v3396_v40, %v3397_v46 }
 0x67d   : > { %v2855_v61 = vand.u32 4294901760, %v2854_v58  ;;  %v2769_v62 = vand.u32 4294901760, %v2756_v60 }
 0x67e   : > { %v2760_v63 = vsel %vm2730_vm3, %v2750_v59, 0 }
 0x67f   : > { %v4928_v0 = vpop.eup %4927  ;;  %v4693_v1 = vpack.c.bf16 %v2769_v62, %v2766_v56  ;;  %v2861_v2 = vsub.f32 %v2756_v60, %v2769_v62  ;;  %v2832_v3 = vand.u32 4294901760, %v2760_v63  ;;  %v2856_v5 = vsub.f32 %v2854_v58, %v2855_v61 }
 0x680   : > { %v2752_v4 = vmul.f32 %v4928_v0, %v4924_v51  ;;  %v3399_v51 = vand.u32 4294901760, %v3398_v49  ;;  %v4753_v56 = vpack.c.bf16 %v3397_v46, %v3390_v44 }
 0x681   : > { %v2862_v6 = vand.u32 4294901760, %v2861_v2  ;;  %4694 = vmatprep.subr.bf16.mxu0 %v4693_v1  ;;  %v2833_v7 = vsub.f32 %v2760_v63, %v2832_v3  ;;  %v2857_v14 = vand.u32 4294901760, %v2856_v5  ;;  %v4701_v21 = vpack.c.bf16 %v2861_v2, %v2854_v58 }
 0x682   : > { %4696 = vmatpush3.bf16.msra.mxu0 %v4693_v1  ;;  %v2763_v8 = vsel %vm2730_vm3, %v2752_v4, 0  ;;  %v4729_v52 = vpack.c.bf16 %v3399_v51, %v3392_v50 }
 0x683   : > { %v2863_v9 = vsub.f32 %v2861_v2, %v2862_v6  ;;  %v2834_v10 = vand.u32 4294901760, %v2833_v7  ;;  %v2842_v11 = vand.u32 4294901760, %v2763_v8  ;;  %v4709_v22 = vpack.c.bf16 %v2862_v6, %v2855_v61 }
 0x685   : > { %v2864_v12 = vand.u32 4294901760, %v2863_v9  ;;  %v2835_v13 = vsub.f32 %v2833_v7, %v2834_v10  ;;  %v2843_v15 = vsub.f32 %v2763_v8, %v2842_v11 }
 0x687   : > { %v2836_v16 = vand.u32 4294901760, %v2835_v13  ;;  %v4697_v17 = vpack.c.bf16 %v2864_v12, %v2857_v14  ;;  %v2844_v18 = vand.u32 4294901760, %v2843_v15 }
 0x689   : > { %4469 = vmatprep.mubr.f32.mxu0 %v2836_v16  ;;  %4698 = vmatprep.subr.bf16.mxu0 %v4697_v17  ;;  %v2845_v19 = vsub.f32 %v2843_v15, %v2844_v18 }
 0x68b   : > { %v2846_v20 = vand.u32 4294901760, %v2845_v19 }
 0x68d   : > { %4470 = vmatmul.mubr.f32.vlgmr.msra.gmra.mrb[4].mxu0 %v2846_v20 }
 0x68e   : > { %4700 = vmatpush3.bf16.msra.mxu0 %v4697_v17  ;;  %4476 = vmatprep.mubr.f32.mxu0 %v2832_v3 }
 0x68f   : > { %4702 = vmatprep.subr.bf16.mxu0 %v4701_v21 }
 0x695   : > { %4477 = vmatmul.mubr.f32.vlgmr.msra.gmra.mrb[4].mxu0 %v2842_v11 }
 0x696   : > { %4704 = vmatpush3.bf16.msra.mxu0 %v4701_v21  ;;  %4483 = vmatprep.mubr.f32.mxu0 %v2833_v7  ;;  %v4078_v7 = vld [vmem:[%s5644_s4] ss:$0 sm:$0xff] }
 0x697   : > { %4706 = vmatprep.subr.bf16.mxu0 %v4693_v1 }
 0x69d   : > { %4484 = vmatmul.mubr.f32.vlgmr.msra.gmra.mrb[4].mxu0 %v2843_v15 }
 0x69e   : > { %4708 = vmatpush3.bf16.msra.mxu0 %v4693_v1  ;;  %4490 = vmatprep.mubr.f32.mxu0 %v2834_v10 }
 0x69f   : > { %4710 = vmatprep.subr.bf16.mxu0 %v4709_v22 }
 0x6a5   : > { %4491 = vmatmul.mubr.f32.vlgmr.msra.gmra.mrb[4].mxu0 %v2844_v18 }
 0x6a6   : > { %4712 = vmatpush3.bf16.msra.mxu0 %v4709_v22  ;;  %4497 = vmatprep.mubr.f32.mxu0 %v2832_v3 }
 0x6a7   : > { %4714 = vmatprep.subr.bf16.mxu0 %v4693_v1 }
 0x6ad   : > { %4498 = vmatmul.mubr.f32.vlgmr.msra.gmra.mrb[4].mxu0 %v2842_v11 }
 0x6ae   : > { %4716 = vmatpush3.bf16.msra.mxu0 %v4693_v1  ;;  %4504 = vmatprep.mubr.f32.mxu0 %v2832_v3 }
 0x6af   : > { %4718 = vmatprep.subr.bf16.mxu0 %v5529_v27 }
 0x6b5   : > { %4505 = vmatmul.mubr.f32.vlgmr.msra.gmra.mrb[4].mxu0 %v2842_v11 }
 0x6b6   : > { %4720 = vmatpush3.bf16.msra.mxu0 %v5529_v27 }
 0x6b7   : > { %4722 = vmatprep.subr.bf16.mxu0 %v5535_v36 }
 0x6ba   : > { %4724 = vmatpush3.bf16.msra.mxu0 %v5535_v36 }
 0x6bb   : > { %4726 = vmatprep.subr.bf16.mxu0 %v4725_v47 }
 0x788   : > { %v4506_v57 = vpop.f32.mrb[4].mxu0 }
 0x789   : > { %v3282_v58 = vsel %vm1132_vm2, %v4506_v57, 0  ;;  %v3257_v59 = vpop.f32.mrb[5].mxu0 }
 0x78a   : > { %v3363_v60 = vand.u32 4294901760, %v3282_v58  ;;  %v3279_v61 = vsel %vm1132_vm2, %v3257_v59, 0 }
 0x78b   : > { %v3353_v62 = vand.u32 4294901760, %v3279_v61 }
 0x78c   : > { %v3364_v63 = vsub.f32 %v3282_v58, %v3363_v60 }
 0x78d   : > { %v3354_v0 = vsub.f32 %v3279_v61, %v3353_v62 }
 0x78e   : > { %v3365_v1 = vand.u32 4294901760, %v3364_v63 }
 0x78f   : > { %v3355_v2 = vand.u32 4294901760, %v3354_v0 }
 0x790   : > { %v3366_v3 = vsub.f32 %v3364_v63, %v3365_v1 }
 0x791   : > { %v3356_v4 = vsub.f32 %v3354_v0, %v3355_v2 }
 0x792   : > { %v3367_v6 = vand.u32 4294901760, %v3366_v3 }
 0x793   : > { %v3357_v5 = vand.u32 4294901760, %v3356_v4 }
 0x795   : > { %4515 = vmatprep.mubr.f32.mxu0 %v3357_v5 }
 0x796   : > { %4516 = vmatmul.mubr.f32.vlgmr.msra.gmra.mrb[6].mxu0 %v3367_v6 }
 0x797   : > { %4728 = vmatpush3.bf16.msra.mxu0 %v4725_v47  ;;  %4526 = vmatprep.mubr.f32.mxu0 %v3353_v62 }
 0x798   : > { %4730 = vmatprep.subr.bf16.mxu0 %v4729_v52 }
 0x79b   : > { %4732 = vmatpush3.bf16.msra.mxu0 %v4729_v52 }
 0x79c   : > { %4734 = vmatprep.subr.bf16.mxu0 %v4733_v53 }
 0x79e   : > { %4527 = vmatmul.mubr.f32.vlgmr.msra.gmra.mrb[6].mxu0 %v3363_v60 }
 0x79f   : > { %4736 = vmatpush3.bf16.msra.mxu0 %v4733_v53  ;;  %4537 = vmatprep.mubr.f32.mxu0 %v3354_v0 }
 0x7a0   : > { %4738 = vmatprep.subr.bf16.mxu0 %v4737_v54 }
 0x7a3   : > { %4740 = vmatpush3.bf16.msra.mxu0 %v4737_v54 }
 0x7a4   : > { %4742 = vmatprep.subr.bf16.mxu0 %v5529_v27 }
 0x7a6   : > { %4538 = vmatmul.mubr.f32.vlgmr.msra.gmra.mrb[6].mxu0 %v3364_v63 }
 0x7a7   : > { %4744 = vmatpush3.bf16.msra.mxu0 %v5529_v27  ;;  %4548 = vmatprep.mubr.f32.mxu0 %v3355_v2 }
 0x7a8   : > { %4746 = vmatprep.subr.bf16.mxu0 %v5535_v36 }
 0x7ab   : > { %4748 = vmatpush3.bf16.msra.mxu0 %v5535_v36 }
 0x7ac   : > { %4750 = vmatprep.subr.bf16.mxu0 %v4749_v55 }
 0x7ae   : > { %4549 = vmatmul.mubr.f32.vlgmr.msra.gmra.mrb[6].mxu0 %v3365_v1 }
 0x7af   : > { %4752 = vmatpush3.bf16.msra.mxu0 %v4749_v55  ;;  %4559 = vmatprep.mubr.f32.mxu0 %v3353_v62 }
 0x7b0   : > { %4754 = vmatprep.subr.bf16.mxu0 %v4753_v56 }
 0x7b3   : > { %4756 = vmatpush3.bf16.msra.mxu0 %v4753_v56 }
 0x7b4   : > { %4758 = vmatprep.subr.bf16.mxu0 %v5529_v27 }
 0x7b6   : > { %4560 = vmatmul.mubr.f32.vlgmr.msra.gmra.mrb[6].mxu0 %v3363_v60 }
 0x7b7   : > { %4760 = vmatpush3.bf16.msra.mxu0 %v5529_v27  ;;  %4570 = vmatprep.mubr.f32.mxu0 %v3353_v62 }
 0x7b8   : > { %4762 = vmatprep.subr.bf16.mxu0 %v5535_v36 }
 0x7bb   : > { %4764 = vmatpush3.bf16.msra.mxu0 %v5535_v36 }
 0x7be   : > { %4571 = vmatmul.mubr.f32.vlgmr.msra.gmra.mrb[6].mxu0 %v3363_v60 }
 0x891   : > { %v4572_v8 = vpop.f32.mrb[6].mxu0 }
 0x892   : > { %v4773_v9 = vadd.f32 %v4572_v8, %v4078_v7  ;;  %v3802_v10 = vpop.f32.mrb[7].mxu0 }
 0x893   : > { %v4774_v11 = vadd.f32 %v4078_v7, %v3802_v10 }
 0x894   : > { %v3813_v12 = vadd.f32 %v4773_v9, %v5492_v42 }
 0x895   : > { %v3812_v13 = vadd.f32 %v4774_v11, %v5495_v45 }
 0x896   : > { %v3815_v14 = vsel %vm1132_vm2, %v3813_v12, 0.0 }
 0x897   : > { %v3814_v15 = vsel %vm1132_vm2, %v3812_v13, 0.0 }
 0x898   : > { %v3816_v16 = vadd.f32 %v3815_v14, %v3814_v15 }
 0x89a   : > { %v3817_v17 = vrot.slane %v3816_v16, 4 }
 0x89c   : > { %v3818_v18 = vadd.f32 %v3817_v17, %v3816_v16 }
 0x89e   : > { %v3819_v19 = vrot.slane %v3818_v18, 2 }
 0x8a0   : > { %v3820_v20 = vadd.f32 %v3819_v19, %v3818_v18 }
 0x8a2   : > { %v3821_v21 = vrot.slane %v3820_v20, 1 }
 0x8a4   : > { %v3822_v22 = vadd.f32 %v3821_v21, %v3820_v20 }
 0x8a6   : > { %v3824_v23 = vmul.f32 0.0625, %v3822_v22 }
 0x8a8   : > { %v3825_v24 = vsub.f32 %v3812_v13, %v3824_v23  ;;  %v3826_v25 = vsub.f32 %v3813_v12, %v3824_v23 }
 0x8aa   : > { %v3827_v26 = vmul.f32 %v3825_v24, %v3825_v24  ;;  %v3828_v27 = vmul.f32 %v3826_v25, %v3826_v25 }
 0x8ac   : > { %v3829_v42 = vsel %vm1132_vm2, %v3827_v26, 0.0  ;;  %v3830_v45 = vsel %vm1132_vm2, %v3828_v27, 0.0 }
 0x8ad   : > { %v3831_v28 = vadd.f32 %v3830_v45, %v3829_v42 }
 0x8af   : > { %v3832_v29 = vrot.slane %v3831_v28, 4 }
 0x8b1   : > { %v3833_v30 = vadd.f32 %v3832_v29, %v3831_v28 }
 0x8b3   : > { %v3834_v31 = vrot.slane %v3833_v30, 2 }
 0x8b5   : > { %v3835_v32 = vadd.f32 %v3834_v31, %v3833_v30 }
 0x8b7   : > { %v3836_v33 = vrot.slane %v3835_v32, 1 }
 0x8b9   : > { %v3837_v34 = vadd.f32 %v3836_v33, %v3835_v32 }
 0x8bb   : > { %v3838_v35 = vmul.f32 0.0625, %v3837_v34 }
 0x8bd   : > { %v3839_v36 = vadd.f32 1e-05, %v3838_v35 }
 0x8bf   : > { %4929 = vrsqrt.f32 %v3839_v36 }
 0x8c9   : > { %v4930_v37 = vpop.eup %4929 }
 0x8ca   : > { %v3841_v38 = vmul.f32 %v4930_v37, %v3825_v24  ;;  %v3842_v39 = vmul.f32 %v4930_v37, %v3826_v25 }
 0x8cc   : > { %v3843_v40 = vmax.f32 %v3841_v38, 0.0  ;;  %v3844_v41 = vmax.f32 %v3842_v39, 0.0 }
 0x8ce   : > { %3845 = vst.msk [vmem:[%s5441_s13] sm:$0xff] %vm1132_vm2, %v3843_v40  ;;  %3846 = vst.msk [vmem:[%s5441_s13 + $0x8] sm:$0xff] %vm1132_vm2, %v3844_v41 }
 0x8cf PF: > { %s29_s20 = sadd.s32 1, %s5125_s20   ;;  %s5645_s19 = sld [smem:[#allocation12_spill]] }
 0x8d0   : > { %p26_p11 = scmp.ge.s32.totalorder %s29_s20, 6   ;;  %s5646_s15 = sld [smem:[#allocation16_spill]] }
 0x8d1   : > { %s5647_s17 = sld [smem:[#allocation13_spill]]  ;;  %s5648_s12 = sld [smem:[#allocation14_spill]] }
 0x8d2   : > { %s5649_s5 = sld [smem:[#allocation15_spill]]  ;;  %s5650_s13 = smov %s5101_s14 }
 0x8d3   : > { %s5652_s16 = smov %s5117_s18  ;;  %28 = sbr.rel (!%p26_p11) target bundleno = 20 (0x14), region = 159 }
 0x8d5   : > { %s5651_s14 = smov %s5645_s19 }
 0x8d7   : > { %s5653_s18 = smov %s5648_s12 }
 0x8d8   : > { %s5654_s19 = smov %s5649_s5 }
 0x8da   :  { %3868 = vsyncpa [#allocation3], 1 }
 0x8db   :  { %3870 = vsyncpa [#allocation3 + $0x1], 1 }
 0x8dc   :  { %3871 = vsyncpa [#allocation5], 1 }
 0x8dd   :  { %3873 = vsyncpa [#allocation5 + $0x1], 1 }
 0x8de   :  { %3874 = vsyncpa [#allocation8], 1 }
 0x8df   :  { %3876 = vsyncpa [#allocation8 + $0x1], 1 }

</bundles_post_ra>
